<compile_context>
chip_gen: v7x
topology: tpu7x:2x2x1
jax: 0.10.0
libtpu: 0.0.40
codegen_flags: <defaults>
</compile_context>

<pallas_src>
import functools

import jax
import jax.numpy as jnp
import numpy as np
from jax import lax
from jax.experimental import pallas as pl
from jax.experimental.pallas import tpu as pltpu

# ---- module hyper-parameters (small, consistent with the module defaults) ----
BATCH = 2
SEQ = 8          # n
DIM = 32         # model dim
HEADS = 8
DIM_HEAD = 16
INNER = HEADS * DIM_HEAD   # 128
SCALE = DIM_HEAD ** (-0.5)
# dropout=0.0 -> identity
# TODO(synk): dropout > 0 would need pltpu.prng_seed/prng_random_bits inside the kernel.


def _pick_local_batch(b, seq, heads, *, max_rows=256):
    """Row-based folding rule (perf review item):

    Fold as much of the batch as possible into one grid step so the per-step
    fixed overhead (~0.35us) is paid once and stores stay lane-dense, but cap
    rows-per-step around `max_rows` so larger shapes still pipeline.  Among
    admissible divisors of b, prefer the largest one whose attn slab width
    (local_batch*heads*seq) is a multiple of 128 lanes (unmasked vst).
    """
    admissible = [lb for lb in range(1, b + 1) if b % lb == 0 and lb * seq <= max_rows]
    if not admissible:
        return 1
    lane_aligned = [lb for lb in admissible if (lb * heads * seq) % 128 == 0]
    return max(lane_aligned) if lane_aligned else max(admissible)


def attention_kernel(x_ref, wqkv_ref, wout_ref, bout_ref, out_ref, attn_ref,
                     *, local_batch, seq, dim, heads, dim_head, scale):
    # x_ref:    (1, BB*SEQ, DIM)            VMEM
    # wqkv_ref: (DIM, 3*INNER)              VMEM  (y = x @ wqkv)
    # wout_ref: (INNER, DIM)                VMEM  (y = ctx @ wout + b)
    # bout_ref: (1, DIM)                    VMEM
    # out_ref:  (1, BB*SEQ, DIM)            VMEM  natural row order
    # attn_ref: (1, SEQ, BB*HEADS*SEQ)      VMEM  lane-packed over (batch, head, key)
    inner = heads * dim_head
    groups = local_batch * heads           # batched "bh" dimension

    # One QKV matmul for every row handled this grid step: (BB*S, DIM)@(DIM, 3*INNER).
    x = x_ref[0]                                                   # (BB*S, DIM)
    qkv = jnp.dot(x, wqkv_ref[...], preferred_element_type=jnp.float32)
    q_all = qkv[:, :inner]                                         # 128-lane aligned slices
    k_all = qkv[:, inner:2 * inner]
    v_all = qkv[:, 2 * inner:3 * inner]

    def to_heads(t):  # (BB*S, INNER) -> (BB*H, S, d): one reshape+transpose per tensor
        return (t.reshape(local_batch, seq, heads, dim_head)
                 .transpose(0, 2, 1, 3)
                 .reshape(groups, seq, dim_head))

    q = to_heads(q_all)                                            # (G, S, d)
    k = to_heads(k_all)
    v = to_heads(v_all)

    # Batched q @ k^T contracting last dims (no materialized per-head k.T):
    # (G, S, d) x (G, S, d) -> (G, S, S)
    sim = lax.dot_general(q, k, (((2,), (2,)), ((0,), (0,))),
                          preferred_element_type=jnp.float32) * scale

    # Single consolidated softmax pass over the whole (G, S, S) tensor:
    # one max, one exp, one sum, one reciprocal, one multiply.
    sim_max = jnp.max(sim, axis=-1, keepdims=True)
    e = jnp.exp(sim - sim_max)
    denom = jnp.sum(e, axis=-1, keepdims=True)
    # exact reciprocal keeps attn within 1e-5 of the reference softmax.
    attn = e * pl.reciprocal(denom, approx=False)                  # (G, S, S)

    # Batched attn @ v: (G, S, S) x (G, S, d) -> (G, S, d)
    ctx = lax.dot_general(attn, v, (((2,), (1,)), ((0,), (0,))),
                          preferred_element_type=jnp.float32)

    # 'g s d -> (b s) (h d)' : one layout op instead of the 8-way lane concat.
    ctx_rows = (ctx.reshape(local_batch, heads, seq, dim_head)
                   .transpose(0, 2, 1, 3)
                   .reshape(local_batch * seq, inner))             # (BB*S, INNER)

    # Single output projection with a full K=128 contraction: (BB*S,128)@(128,32).
    out_all = jnp.dot(ctx_rows, wout_ref[...],
                      preferred_element_type=jnp.float32) + bout_ref[...]

    # Natural row order store: no in-kernel concat, no wrapper transpose.
    out_ref[0] = out_all                                           # (BB*S, DIM)
    # attn lane-packed slab: (G, Sq, Sk) -> (Sq, G*Sk) = (S, BB*H*S), dense 128 lanes.
    attn_ref[0] = attn.transpose(1, 0, 2).reshape(seq, groups * seq)


def attention_forward(x, w_qkv, w_out, b_out, *, heads=HEADS, dim_head=DIM_HEAD,
                      scale=SCALE):
    """x: (B, N, DIM) f32. w_qkv: (DIM, 3*INNER). w_out: (INNER, DIM). b_out: (DIM,)."""
    b, n, dim = x.shape
    inner = heads * dim_head

    # Fold the batch (row-based rule); at B=2,S=8 this is a single grid step.
    local_batch = _pick_local_batch(b, n, heads)
    num_steps = b // local_batch

    x2d = x.reshape(num_steps, local_batch * n, dim)
    b_out2d = b_out.reshape(1, dim)

    kernel = functools.partial(attention_kernel, local_batch=local_batch, seq=n,
                               dim=dim, heads=heads, dim_head=dim_head, scale=scale)
    out_shapes = (
        jax.ShapeDtypeStruct((num_steps, local_batch * n, dim), jnp.float32),
        jax.ShapeDtypeStruct((num_steps, n, local_batch * heads * n), jnp.float32),
    )
    out_flat, attn_flat = pl.pallas_call(
        kernel,
        out_shape=out_shapes,
        grid_spec=pltpu.PrefetchScalarGridSpec(
            num_scalar_prefetch=0,
            grid=(num_steps,),
            in_specs=[
                pl.BlockSpec((1, local_batch * n, dim), lambda i: (i, 0, 0)),
                pl.BlockSpec((dim, 3 * inner), lambda i: (0, 0)),
                pl.BlockSpec((inner, dim), lambda i: (0, 0)),
                pl.BlockSpec((1, dim), lambda i: (0, 0)),
            ],
            out_specs=[
                pl.BlockSpec((1, local_batch * n, dim), lambda i: (i, 0, 0)),
                pl.BlockSpec((1, n, local_batch * heads * n), lambda i: (i, 0, 0)),
            ],
        ),
        compiler_params=pltpu.CompilerParams(
            dimension_semantics=("parallel",)),
    )(x2d, w_qkv, w_out, b_out2d)

    # out: natural row order -> free reshape only (no transpose kernel).
    out = out_flat.reshape(b, n, dim)
    # attn: undo the lane packing (batch-major, then head, then key position).
    attn = (attn_flat.reshape(num_steps, n, local_batch, heads, n)
            .transpose(0, 2, 3, 1, 4).reshape(b, heads, n, n))
    return out, attn


def reference_forward(x, w_qkv, w_out, b_out, *, heads=HEADS, dim_head=DIM_HEAD,
                      scale=SCALE):
    b, n, dim = x.shape
    inner = heads * dim_head
    qkv = jnp.einsum('bnd,de->bne', x, w_qkv)
    q, k, v = qkv[..., :inner], qkv[..., inner:2 * inner], qkv[..., 2 * inner:]
    def split(t):  # 'b n (h d) -> b h n d'
        return t.reshape(b, n, heads, dim_head).transpose(0, 2, 1, 3)
    q, k, v = split(q), split(k), split(v)
    sim = jnp.einsum('bhid,bhjd->bhij', q, k) * scale
    attn = jax.nn.softmax(sim, axis=-1)
    out = jnp.einsum('bhij,bhjd->bhid', attn, v)
    out = out.transpose(0, 2, 1, 3).reshape(b, n, inner)
    return out @ w_out + b_out, attn


if __name__ == "__main__":
    key = jax.random.PRNGKey(0)
    kx, kq, kw, kb = jax.random.split(key, 4)

    x = jax.random.normal(kx, (BATCH, SEQ, DIM), dtype=jnp.float32)
    # Deterministic "init": to_qkv weight (no bias) and to_out weight+bias,
    # stored already transposed for right-multiplication (y = x @ W).
    w_qkv = jax.random.normal(kq, (DIM, 3 * INNER), dtype=jnp.float32) * 0.05
    w_out = jax.random.normal(kw, (INNER, DIM), dtype=jnp.float32) * 0.05
    b_out = jax.random.normal(kb, (DIM,), dtype=jnp.float32) * 0.05

    out, attn = attention_forward(x, w_qkv, w_out, b_out)
    jax.block_until_ready((out, attn))

    ref_out, ref_attn = reference_forward(x, w_qkv, w_out, b_out)
    np.testing.assert_allclose(np.asarray(out), np.asarray(ref_out),
                               rtol=1e-5, atol=1e-5)
    np.testing.assert_allclose(np.asarray(attn), np.asarray(ref_attn),
                               rtol=1e-5, atol=1e-5)
    print("KERNEL_OK")
</pallas_src>

<mosaic_0001>
module attributes {stable_mosaic.version = 11 : i64} {
  func.func @attention_kernel(%arg0: i32, %arg1: memref<1x16x32xf32, #tpu.memory_space<vmem>>, %arg2: memref<32x384xf32, #tpu.memory_space<vmem>>, %arg3: memref<128x32xf32, #tpu.memory_space<vmem>>, %arg4: memref<1x32xf32, #tpu.memory_space<vmem>>, %arg5: memref<1x16x32xf32, #tpu.memory_space<vmem>>, %arg6: memref<1x8x128xf32, #tpu.memory_space<vmem>>) attributes {dimension_semantics = [#tpu.dimension_semantics<parallel>], iteration_bounds = array<i64: 1>, scalar_prefetch = 0 : i64, scratch_operands = 0 : i64, tpu.core_type = #tpu.core_type<tc>, window_params = [{transform_indices = @transform_0, window_bounds = array<i64: 1, 16, 32>}, {pipeline_mode = #tpu.pipeline_mode<synchronous>, transform_indices = @transform_1, window_bounds = array<i64: 32, 384>}, {pipeline_mode = #tpu.pipeline_mode<synchronous>, transform_indices = @transform_2, window_bounds = array<i64: 128, 32>}, {pipeline_mode = #tpu.pipeline_mode<synchronous>, transform_indices = @transform_3, window_bounds = array<i64: 1, 32>}, {transform_indices = @transform_4, window_bounds = array<i64: 1, 16, 32>}, {transform_indices = @transform_5, window_bounds = array<i64: 1, 8, 128>}]} {
    %c0 = arith.constant 0 : index
    %c0_0 = arith.constant 0 : index
    %c0_1 = arith.constant 0 : index
    %0 = vector.load %arg1[%c0, %c0_0, %c0_1] : memref<1x16x32xf32, #tpu.memory_space<vmem>>, vector<1x16x32xf32>
    %1 = vector.shape_cast %0 : vector<1x16x32xf32> to vector<16x32xf32>
    %c0_2 = arith.constant 0 : index
    %c0_3 = arith.constant 0 : index
    %2 = vector.load %arg2[%c0_2, %c0_3] : memref<32x384xf32, #tpu.memory_space<vmem>>, vector<32x384xf32>
    %cst = arith.constant dense<0.000000e+00> : vector<16x384xf32>
    %3 = tpu.matmul %1, %2, %cst {dimension_numbers = #tpu.dot_dimension_numbers<[1], [0], [0], [1], [0, 0, 1, 1], [], []>} : vector<16x32xf32>, vector<32x384xf32>, vector<16x384xf32> -> vector<16x384xf32>
    %4 = vector.extract_strided_slice %3 {offsets = [0, 0], sizes = [16, 128], strides = [1, 1]} : vector<16x384xf32> to vector<16x128xf32>
    %5 = vector.extract_strided_slice %3 {offsets = [0, 128], sizes = [16, 128], strides = [1, 1]} : vector<16x384xf32> to vector<16x128xf32>
    %6 = vector.extract_strided_slice %3 {offsets = [0, 256], sizes = [16, 128], strides = [1, 1]} : vector<16x384xf32> to vector<16x128xf32>
    %7 = vector.shape_cast %4 : vector<16x128xf32> to vector<2x8x8x16xf32>
    %8 = tpu.transpose %7, [0, 2, 1, 3] : vector<2x8x8x16xf32> -> vector<2x8x8x16xf32>
    %9 = vector.shape_cast %8 : vector<2x8x8x16xf32> to vector<16x8x16xf32>
    %10 = vector.shape_cast %5 : vector<16x128xf32> to vector<2x8x8x16xf32>
    %11 = tpu.transpose %10, [0, 2, 1, 3] : vector<2x8x8x16xf32> -> vector<2x8x8x16xf32>
    %12 = vector.shape_cast %11 : vector<2x8x8x16xf32> to vector<16x8x16xf32>
    %13 = vector.shape_cast %6 : vector<16x128xf32> to vector<2x8x8x16xf32>
    %14 = tpu.transpose %13, [0, 2, 1, 3] : vector<2x8x8x16xf32> -> vector<2x8x8x16xf32>
    %15 = vector.shape_cast %14 : vector<2x8x8x16xf32> to vector<16x8x16xf32>
    %cst_4 = arith.constant dense<0.000000e+00> : vector<16x8x8xf32>
    %16 = tpu.matmul %9, %12, %cst_4 {dimension_numbers = #tpu.dot_dimension_numbers<[2], [2], [1], [1], [0, 0, 0, 1, 1, 1], [0], [0]>} : vector<16x8x16xf32>, vector<16x8x16xf32>, vector<16x8x8xf32> -> vector<16x8x8xf32>
    %cst_5 = arith.constant 2.500000e-01 : f32
    %17 = vector.broadcast %cst_5 : f32 to vector<16x8x8xf32>
    %18 = arith.mulf %16, %17 : vector<16x8x8xf32>
    %cst_6 = arith.constant dense<0xFF800000> : vector<16x8xf32>
    %19 = vector.multi_reduction <maximumf>, %18, %cst_6 [2] : vector<16x8x8xf32> to vector<16x8xf32>
    %20 = vector.shape_cast %19 : vector<16x8xf32> to vector<16x8x1xf32>
    %21 = vector.broadcast %20 : vector<16x8x1xf32> to vector<16x8x8xf32>
    %22 = arith.subf %18, %21 : vector<16x8x8xf32>
    %23 = math.exp %22 : vector<16x8x8xf32>
    %cst_7 = arith.constant dense<0.000000e+00> : vector<16x8xf32>
    %24 = vector.multi_reduction <add>, %23, %cst_7 [2] : vector<16x8x8xf32> to vector<16x8xf32>
    %25 = vector.shape_cast %24 : vector<16x8xf32> to vector<16x8x1xf32>
    %26 = tpu.reciprocal %25 : vector<16x8x1xf32> -> vector<16x8x1xf32>
    %27 = vector.broadcast %26 : vector<16x8x1xf32> to vector<16x8x8xf32>
    %28 = arith.mulf %23, %27 : vector<16x8x8xf32>
    %cst_8 = arith.constant dense<0.000000e+00> : vector<16x8x16xf32>
    %29 = tpu.matmul %28, %15, %cst_8 {dimension_numbers = #tpu.dot_dimension_numbers<[2], [1], [1], [2], [0, 0, 0, 1, 1, 2], [0], [0]>} : vector<16x8x8xf32>, vector<16x8x16xf32>, vector<16x8x16xf32> -> vector<16x8x16xf32>
    %30 = vector.shape_cast %29 : vector<16x8x16xf32> to vector<2x8x8x16xf32>
    %31 = tpu.transpose %30, [0, 2, 1, 3] : vector<2x8x8x16xf32> -> vector<2x8x8x16xf32>
    %32 = vector.shape_cast %31 : vector<2x8x8x16xf32> to vector<16x128xf32>
    %c0_9 = arith.constant 0 : index
    %c0_10 = arith.constant 0 : index
    %33 = vector.load %arg3[%c0_9, %c0_10] : memref<128x32xf32, #tpu.memory_space<vmem>>, vector<128x32xf32>
    %cst_11 = arith.constant dense<0.000000e+00> : vector<16x32xf32>
    %34 = tpu.matmul %32, %33, %cst_11 {dimension_numbers = #tpu.dot_dimension_numbers<[1], [0], [0], [1], [0, 0, 1, 1], [], []>} : vector<16x128xf32>, vector<128x32xf32>, vector<16x32xf32> -> vector<16x32xf32>
    %c0_12 = arith.constant 0 : index
    %c0_13 = arith.constant 0 : index
    %35 = vector.load %arg4[%c0_12, %c0_13] : memref<1x32xf32, #tpu.memory_space<vmem>>, vector<1x32xf32>
    %36 = vector.broadcast %35 : vector<1x32xf32> to vector<16x32xf32>
    %37 = arith.addf %34, %36 : vector<16x32xf32>
    %c0_14 = arith.constant 0 : index
    %c0_15 = arith.constant 0 : index
    %c0_16 = arith.constant 0 : index
    %38 = vector.load %arg5[%c0_14, %c0_15, %c0_16] : memref<1x16x32xf32, #tpu.memory_space<vmem>>, vector<1x16x32xf32>
    %39 = vector.shape_cast %38 : vector<1x16x32xf32> to vector<16x32xf32>
    %40 = vector.shape_cast %37 : vector<16x32xf32> to vector<1x16x32xf32>
    tpu.vector_store %arg5[%c0_14, %c0_15, %c0_16], %40 {strides = array<i32>} : memref<1x16x32xf32, #tpu.memory_space<vmem>>, vector<1x16x32xf32>,
    %41 = tpu.transpose %28, [1, 0, 2] : vector<16x8x8xf32> -> vector<8x16x8xf32>
    %42 = vector.shape_cast %41 : vector<8x16x8xf32> to vector<8x128xf32>
    %c0_17 = arith.constant 0 : index
    %c0_18 = arith.constant 0 : index
    %c0_19 = arith.constant 0 : index
    %43 = vector.load %arg6[%c0_17, %c0_18, %c0_19] : memref<1x8x128xf32, #tpu.memory_space<vmem>>, vector<1x8x128xf32>
    %44 = vector.shape_cast %43 : vector<1x8x128xf32> to vector<8x128xf32>
    %45 = vector.shape_cast %42 : vector<8x128xf32> to vector<1x8x128xf32>
    tpu.vector_store %arg6[%c0_17, %c0_18, %c0_19], %45 {strides = array<i32>} : memref<1x8x128xf32, #tpu.memory_space<vmem>>, vector<1x8x128xf32>,
    return
  }
  func.func @transform_0(%arg0: i32) -> (i32, i32, i32) {
    %c0_i32 = arith.constant 0 : i32
    %c0_i32_0 = arith.constant 0 : i32
    %c0_i32_1 = arith.constant 0 : i32
    return %arg0, %c0_i32, %c0_i32_0 : i32, i32, i32
  }
  func.func @transform_1(%arg0: i32) -> (i32, i32) {
    %c0_i32 = arith.constant 0 : i32
    %c0_i32_0 = arith.constant 0 : i32
    %c0_i32_1 = arith.constant 0 : i32
    return %c0_i32, %c0_i32_0 : i32, i32
  }
  func.func @transform_2(%arg0: i32) -> (i32, i32) {
    %c0_i32 = arith.constant 0 : i32
    %c0_i32_0 = arith.constant 0 : i32
    %c0_i32_1 = arith.constant 0 : i32
    return %c0_i32, %c0_i32_0 : i32, i32
  }
  func.func @transform_3(%arg0: i32) -> (i32, i32) {
    %c0_i32 = arith.constant 0 : i32
    %c0_i32_0 = arith.constant 0 : i32
    %c0_i32_1 = arith.constant 0 : i32
    return %c0_i32, %c0_i32_0 : i32, i32
  }
  func.func @transform_4(%arg0: i32) -> (i32, i32, i32) {
    %c0_i32 = arith.constant 0 : i32
    %c0_i32_0 = arith.constant 0 : i32
    %c0_i32_1 = arith.constant 0 : i32
    return %arg0, %c0_i32, %c0_i32_0 : i32, i32, i32
  }
  func.func @transform_5(%arg0: i32) -> (i32, i32, i32) {
    %c0_i32 = arith.constant 0 : i32
    %c0_i32_0 = arith.constant 0 : i32
    %c0_i32_1 = arith.constant 0 : i32
    return %arg0, %c0_i32, %c0_i32_0 : i32, i32, i32
  }
}

</mosaic_0001>

<bundles_post_ra>
// kernel: tpu_custom_call.1
= control target key start
LH: loop header
LB: loop body
LE: loop exit
PB: predicated region body
PF: predicated region fallthrough
CT: control target
= control target key end

     0   :  { %11 = vsyncpa [#allocation3], 0  ;;  %v6556_v7 = vmov 0.0   ;;  %s7999_s0 = inlined_call_operand.vmem [shape: f32[1,16,32], index: 0, kind: input, shape index: {}]   ;;  %s8000_s1 = inlined_call_operand.vmem [shape: f32[32,384], index: 1, kind: input, shape index: {}]   ;;  %s8001_s2 = inlined_call_operand.vmem [shape: f32[128,32], index: 2, kind: input, shape index: {}]   ;;  %s8002_s3 = inlined_call_operand.vmem [shape: f32[1,32], index: 3, kind: input, shape index: {}]   ;;  %s8003_s4 = inlined_call_operand.hbm [shape: f32[1,16,32], index: 4, kind: output, shape index: {0}]   ;;  %s8004_s5 = inlined_call_operand.hbm [shape: f32[1,8,128], index: 5, kind: output, shape index: {1}]  }
   0x1   :  { %v24_v0 = vld [vmem:[%s8000_s1 + $0x8] sm:$0xff]  ;;  %v27_v1 = vld [vmem:[%s8000_s1 + $0x20] sm:$0xff]  ;;  %v26_v4 = vld [vmem:[%s8000_s1 + $0x18] sm:$0xff]  ;;  %106 = vmatprep.mubr.f32.mxu0 %v6556_v7  ;;  %6164 = vmatprep.subr.mxu1 %v6556_v7 }
   0x2   :  { %v23_v2 = vld [vmem:[%s8000_s1] sm:$0xff]  ;;  %v6339_v3 = vpack.c.bf16 %v27_v1, %v24_v0  ;;  %v30_v5 = vld [vmem:[%s8000_s1 + $0x38] sm:$0xff]  ;;  %v33_v6 = vld [vmem:[%s8000_s1 + $0x50] sm:$0xff] }
   0x3   :  { %v6341_v8 = vpack.c.bf16 %v26_v4, %v23_v2  ;;  %v6343_v9 = vpack.c.bf16 %v33_v6, %v30_v5  ;;  %v29_v10 = vld [vmem:[%s8000_s1 + $0x30] sm:$0xff]  ;;  %v32_v11 = vld [vmem:[%s8000_s1 + $0x48] sm:$0xff] }
   0x4   :  { %6340 = vmatprep.subr.bf16.mxu0 %v6339_v3  ;;  %v25_v12 = vld [vmem:[%s8000_s1 + $0x10] sm:$0xff]  ;;  %v28_v13 = vld [vmem:[%s8000_s1 + $0x28] sm:$0xff]  ;;  %v6345_v14 = vpack.c.bf16 %v32_v11, %v29_v10 }
   0x5   :  { %6342 = vmatpush1.bf16.msra.mxu0 %v6341_v8 }
   0x6   :  { %12 = vsyncpa [#allocation5], 0  ;;  %6344 = vmatprep.subr.bf16.mxu0 %v6343_v9  ;;  %v6347_v15 = vpack.c.bf16 %v28_v13, %v25_v12  ;;  %v31_v16 = vld [vmem:[%s8000_s1 + $0x40] sm:$0xff]  ;;  %v34_v17 = vld [vmem:[%s8000_s1 + $0x58] sm:$0xff]  ;;  %vm35_vm0 = vcmask 261120   ;;  %s6557_s1 = smov 96   ;;  %v243_v29 = vlaneseq }
   0x7   :  { %v21_v18 = vld [vmem:[%s7999_s0] sm:$0xff]  ;;  %v6351_v19 = vpack.c.bf16 %v34_v17, %v31_v16  ;;  %v22_v20 = vld [vmem:[%s7999_s0 + $0x8] sm:$0xff]  ;;  %s6558_s21 = smov 112   ;;  %s6559_s0 = smov 64   ;;  %vm6564_vm1 = vmmov 0   ;;  %vm1958_vm2 = vcmask 130048  }
   0x8   :  { %s6560_s22 = smov 80   ;;  %s6561_s23 = smov 32   ;;  %6166 = vmatprep.mubr.msk.f32.mxu1 %vm6564_vm1, %v6556_v7  ;;  %v6565_v27 = vmov 1983009808   ;;  %v6566_v30 = vmov 1934713408  }
   0x9   :  { %6346 = vmatpush1.bf16.msra.mxu0 %v6345_v14  ;;  %s6562_s24 = smov 48   ;;  %s6563_s25 = smov 16   ;;  %v241_v28 = vunpack.c.l.s4 %v6565_v27  ;;  %v305_v31 = vunpack.c.l.s4 %v6566_v30  ;;  %v244_v33 = vshrl.u32 %v243_v29, 7  ;;  %vm3191_vm3 = vcmask 64512  }
   0xa   :  { %6348 = vmatprep.subr.bf16.mxu0 %v6347_v15  ;;  %s6568_s13 = smov 24   ;;  %s6574_s14 = smov 120   ;;  %vm5140_vm4 = vcmask 392192   ;;  %vm5143_vm5 = vcmask 523264   ;;  %vm5146_vm6 = vcmask 654336   ;;  %vm5149_vm7 = vcmask 785408  }
   0xb   :  { %v242_v32 = vunpack.c.0.s8 %v241_v28  ;;  %v306_v36 = vunpack.c.0.s8 %v305_v31  ;;  %vm5152_vm8 = vcmask 916480   ;;  %vm5861_vm9 = vcmask 195584  }
   0xc   :  { %5912 = vmatmul.mubr.msk.f32.vlgmr.msra.gmra.mrb[0].mxu0 %vm35_vm0, %v21_v18  ;;  %vm5864_vm10 = vcmask 326656   ;;  %vm5867_vm11 = vcmask 457728   ;;  %vm5870_vm12 = vcmask 588800   ;;  %vm5873_vm13 = vcmask 719872  }
   0xd   :  { %112 = vmatprep.mubr.f32.mxu0 %v6556_v7  ;;  %6350 = vmatpush3.bf16.msra.mxu0 %v6347_v15  ;;  %v6744_v37 = vsub.s32 %v242_v32, %v244_v33  ;;  %v6748_v44 = vsub.s32 %v306_v36, %v244_v33  ;;  %vm5876_vm14 = vcmask 850944   ;;  %vm5879_vm15 = vcmask 982016  }
   0xe   :  { %6352 = vmatprep.subr.bf16.mxu0 %v6351_v19 }
  0x10   :  { %5913 = vmatmul.mubr.msk.f32.gmra.mrb[2].mxu0 %vm35_vm0, %v22_v20 }
  0x11   :  { %6354 = vmatpush3.bf16.msra.mxu0 %v6351_v19  ;;  %6141 = vmatprep.mubr.msk.f32.mxu0 %vm35_vm0, %v21_v18 }
  0x12   :  { %6144 = vmatprep.subr.mxu0 %v6556_v7 }
  0x14   :  { %6142 = vmatmul.mubr.msk.f32.vlgmr.msra.gmra.mrb[4].mxu0 %vm35_vm0, %v22_v20 }
  0x15   :  { %6146 = vmatprep.mubr.msk.f32.mxu0 %vm6564_vm1, %v6556_v7 }
  0xdf   :  { %v6658_v21 = vpop.f32.mrb[0].mxu0 }
  0xe0   :  { %202 = vrot.lane.b32.xlu0 %v6658_v21, %s6557_s1  ;;  %196 = vrot.lane.b32.xlu1 %v6658_v21, %s6558_s21  ;;  %v6664_v22 = vpop.f32.mrb[1].mxu0 }
  0xe3   :  { %v6666_v23 = vpop.f32.mrb[2].mxu0 }
  0xe4   :  { %214 = vrot.lane.b32.xlu0 %v6658_v21, %s6559_s0  ;;  %208 = vrot.lane.b32.xlu1 %v6658_v21, %s6560_s22  ;;  %v6672_v24 = vpop.f32.mrb[3].mxu0 }
  0xe7   :  { %v6726_v25 = vpop.f32.mrb[4].mxu0 }
  0xe8   :  { %226 = vrot.lane.b32.xlu0 %v6658_v21, %s6561_s23  ;;  %220 = vrot.lane.b32.xlu1 %v6658_v21, %s6562_s24  ;;  %v6728_v26 = vpop.f32.mrb[5].mxu0 }
  0xec   :  { %232 = vrot.lane.b32.xlu1 %v6658_v21, %s6563_s25  ;;  %784 = vrot.lane.b32.xlu0 %v6664_v22, %s6558_s21 }
  0xf0   :  { %796 = vrot.lane.b32.xlu1 %v6664_v22, %s6560_s22  ;;  %790 = vrot.lane.b32.xlu0 %v6664_v22, %s6557_s1 }
  0xf4   :  { %808 = vrot.lane.b32.xlu1 %v6664_v22, %s6562_s24  ;;  %802 = vrot.lane.b32.xlu0 %v6664_v22, %s6559_s0 }
  0xf8   :  { %820 = vrot.lane.b32.xlu1 %v6664_v22, %s6563_s25  ;;  %814 = vrot.lane.b32.xlu0 %v6664_v22, %s6561_s23 }
  0xfc   :  { %204 = vrot.lane.b32.xlu0 %v6666_v23, %s6557_s1  ;;  %198 = vrot.lane.b32.xlu1 %v6666_v23, %s6558_s21 }
 0x100   :  { %216 = vrot.lane.b32.xlu0 %v6666_v23, %s6559_s0  ;;  %210 = vrot.lane.b32.xlu1 %v6666_v23, %s6560_s22 }
 0x104   :  { %222 = vrot.lane.b32.xlu1 %v6666_v23, %s6562_s24  ;;  %786 = vrot.lane.b32.xlu0 %v6672_v24, %s6558_s21 }
 0x108   :  { %792 = vrot.lane.b32.xlu1 %v6672_v24, %s6557_s1  ;;  %798 = vrot.lane.b32.xlu0 %v6672_v24, %s6560_s22 }
 0x10c   :  { %810 = vrot.lane.b32.xlu1 %v6672_v24, %s6562_s24  ;;  %804 = vrot.lane.b32.xlu0 %v6672_v24, %s6559_s0 }
 0x110   :  { %822 = vrot.lane.b32.xlu1 %v6672_v24, %s6563_s25  ;;  %816 = vrot.lane.b32.xlu0 %v6672_v24, %s6561_s23 }
 0x114   :  { %234 = vrot.lane.b32.xlu1 %v6666_v23, %s6563_s25  ;;  %228 = vrot.lane.b32.xlu0 %v6666_v23, %s6561_s23 }
 0x118   :  { %1372 = vrot.lane.b32.xlu1 %v6728_v26, %s6558_s21  ;;  %1378 = vrot.lane.b32.xlu0 %v6728_v26, %s6557_s1 }
 0x11c   :  { %1384 = vrot.lane.b32.xlu1 %v6728_v26, %s6560_s22  ;;  %1390 = vrot.lane.b32.xlu0 %v6728_v26, %s6559_s0 }
 0x120   :  { %1396 = vrot.lane.b32.xlu1 %v6728_v26, %s6562_s24  ;;  %1408 = vrot.lane.b32.xlu0 %v6728_v26, %s6563_s25 }
 0x124   :  { %1402 = vrot.lane.b32.xlu1 %v6728_v26, %s6561_s23 }
 0x152   :  { %v203_v34 = vpop.permute.xlu0 %202  ;;  %v197_v35 = vpop.permute.xlu1 %196 }
 0x153   :  { %v238_v38 = vcombine.low %v6658_v21, %v203_v34  ;;  %v239_v39 = vcombine.high %v6658_v21, %v203_v34 }
 0x155   :  { %v246_v45 = vrot.slane %v238_v38, %v6744_v37  ;;  %v253_v46 = vrot.slane %v239_v39, %v6744_v37 }
 0x156   :  { %v215_v40 = vpop.permute.xlu0 %214  ;;  %v209_v41 = vpop.permute.xlu1 %208 }
 0x157   :  { %v254_v42 = vcombine.low %v197_v35, %v209_v41  ;;  %v255_v43 = vcombine.high %v197_v35, %v209_v41 }
 0x159   :  { %v262_v47 = vrot.slane %v254_v42, %v6744_v37  ;;  %v269_v48 = vrot.slane %v255_v43, %v6744_v37 }
 0x15a   :  { %v227_v49 = vpop.permute.xlu0 %226  ;;  %v221_v50 = vpop.permute.xlu1 %220 }
 0x15b   :  { %v302_v51 = vcombine.low %v246_v45, %v262_v47  ;;  %v303_v52 = vcombine.high %v246_v45, %v262_v47  ;;  %v318_v53 = vcombine.low %v253_v46, %v269_v48  ;;  %v319_v54 = vcombine.high %v253_v46, %v269_v48 }
 0x15c   :  { %v270_v59 = vcombine.low %v215_v40, %v227_v49  ;;  %v271_v60 = vcombine.high %v215_v40, %v227_v49 }
 0x15d   :  { %v310_v55 = vrot.slane %v302_v51, %v6748_v44  ;;  %v317_v56 = vrot.slane %v303_v52, %v6748_v44  ;;  %v326_v57 = vrot.slane %v318_v53, %v6748_v44  ;;  %v333_v58 = vrot.slane %v319_v54, %v6748_v44 }
 0x15e   :  { %v233_v61 = vpop.permute.xlu1 %232  ;;  %v785_v62 = vpop.permute.xlu0 %784  ;;  %v278_v8 = vrot.slane %v270_v59, %v6744_v37  ;;  %v285_v9 = vrot.slane %v271_v60, %v6744_v37 }
 0x15f   :  { %v5916_v63 = vcombine.low %v310_v55, %v317_v56  ;;  %v5918_v0 = vcombine.high %v310_v55, %v317_v56  ;;  %v5920_v1 = vcombine.low %v326_v57, %v333_v58  ;;  %v5922_v2 = vcombine.high %v326_v57, %v333_v58 }
 0x160   :  { %v286_v3 = vcombine.low %v221_v50, %v233_v61  ;;  %v287_v4 = vcombine.high %v221_v50, %v233_v61 }
 0x161   :  { %v6759_v5 = vrot.slane %v5916_v63, %v6744_v37  ;;  %v6762_v6 = vrot.slane %v5918_v0, %v6744_v37  ;;  %v6769_v14 = vrot.slane %v5920_v1, %v6744_v37  ;;  %v6772_v15 = vrot.slane %v5922_v2, %v6744_v37 }
 0x162   :  { %v294_v10 = vrot.slane %v286_v3, %v6744_v37  ;;  %v301_v11 = vrot.slane %v287_v4, %v6744_v37  ;;  %v797_v12 = vpop.permute.xlu1 %796  ;;  %v791_v13 = vpop.permute.xlu0 %790 }
 0x163   :  { %v574_v16 = vcombine.low %v6759_v5, %v6762_v6  ;;  %v842_v21 = vcombine.low %v785_v62, %v797_v12  ;;  %v843_v27 = vcombine.high %v785_v62, %v797_v12  ;;  %v826_v28 = vcombine.low %v6664_v22, %v791_v13 }
 0x164   :  { %v334_v17 = vcombine.low %v278_v8, %v294_v10  ;;  %v335_v18 = vcombine.high %v278_v8, %v294_v10  ;;  %v350_v19 = vcombine.low %v285_v9, %v301_v11  ;;  %v351_v20 = vcombine.high %v285_v9, %v301_v11 }
 0x165   :  { %v827_v29 = vcombine.high %v6664_v22, %v791_v13  ;;  %v850_v36 = vrot.slane %v842_v21, %v6744_v37  ;;  %v857_v38 = vrot.slane %v843_v27, %v6744_v37  ;;  %v834_v39 = vrot.slane %v826_v28, %v6744_v37 }
 0x166   :  { %v342_v30 = vrot.slane %v334_v17, %v6748_v44  ;;  %v349_v31 = vrot.slane %v335_v18, %v6748_v44  ;;  %v358_v32 = vrot.slane %v350_v19, %v6748_v44  ;;  %v365_v33 = vrot.slane %v351_v20, %v6748_v44  ;;  %v809_v34 = vpop.permute.xlu1 %808  ;;  %v803_v35 = vpop.permute.xlu0 %802 }
 0x167   :  { %v841_v40 = vrot.slane %v827_v29, %v6744_v37  ;;  %v890_v45 = vcombine.low %v834_v39, %v850_v36  ;;  %v891_v46 = vcombine.high %v834_v39, %v850_v36  ;;  %v575_v49 = vcombine.high %v6759_v5, %v6762_v6 }
 0x168   :  { %v5917_v41 = vcombine.low %v342_v30, %v349_v31  ;;  %v5919_v22 = vcombine.high %v342_v30, %v349_v31  ;;  %v5921_v42 = vcombine.low %v358_v32, %v365_v33  ;;  %v5923_v43 = vcombine.high %v358_v32, %v365_v33 }
 0x169   :  { %v906_v47 = vcombine.low %v841_v40, %v857_v38  ;;  %v907_v48 = vcombine.high %v841_v40, %v857_v38  ;;  %v606_v50 = vcombine.low %v6769_v14, %v6772_v15  ;;  %v898_v55 = vrot.slane %v890_v45, %v6748_v44 }
 0x16a   :  { %v6791_v51 = vrot.slane %v5917_v41, %v6744_v37  ;;  %v6794_v52 = vrot.slane %v5919_v22, %v6744_v37  ;;  %v821_v53 = vpop.permute.xlu1 %820  ;;  %v815_v54 = vpop.permute.xlu0 %814  ;;  %v905_v56 = vrot.slane %v891_v46, %v6748_v44  ;;  %v6801_v59 = vrot.slane %v5921_v42, %v6744_v37 }
 0x16b   :  { %v914_v57 = vrot.slane %v906_v47, %v6748_v44  ;;  %v921_v58 = vrot.slane %v907_v48, %v6748_v44  ;;  %v6804_v60 = vrot.slane %v5923_v43, %v6744_v37  ;;  %v874_v61 = vcombine.low %v809_v34, %v821_v53 }
 0x16c   :  { %v875_v62 = vcombine.high %v809_v34, %v821_v53  ;;  %v5932_v63 = vcombine.low %v898_v55, %v905_v56  ;;  %v5934_v0 = vcombine.high %v898_v55, %v905_v56  ;;  %v858_v8 = vcombine.low %v803_v35, %v815_v54 }
 0x16d   :  { %v5936_v1 = vcombine.low %v914_v57, %v921_v58  ;;  %v5938_v2 = vcombine.high %v914_v57, %v921_v58  ;;  %v882_v3 = vrot.slane %v874_v61, %v6744_v37  ;;  %v859_v9 = vcombine.high %v803_v35, %v815_v54 }
 0x16e   :  { %v889_v4 = vrot.slane %v875_v62, %v6744_v37  ;;  %v205_v10 = vpop.permute.xlu0 %204  ;;  %v199_v11 = vpop.permute.xlu1 %198  ;;  %v6809_v12 = vrot.slane %v5932_v63, %v6744_v37  ;;  %v6812_v13 = vrot.slane %v5934_v0, %v6744_v37  ;;  %v866_v19 = vrot.slane %v858_v8, %v6744_v37 }
 0x16f   :  { %v6815_v17 = vrot.slane %v5936_v1, %v6744_v37  ;;  %v6818_v18 = vrot.slane %v5938_v2, %v6744_v37  ;;  %v873_v20 = vrot.slane %v859_v9, %v6744_v37  ;;  %v374_v21 = vcombine.low %v6666_v23, %v205_v10 }
 0x170   :  { %v375_v27 = vcombine.high %v6666_v23, %v205_v10  ;;  %v607_v28 = vcombine.high %v6769_v14, %v6772_v15  ;;  %v591_v29 = vcombine.high %v6791_v51, %v6794_v52  ;;  %v1162_v30 = vcombine.low %v6809_v12, %v6812_v13 }
 0x171   :  { %v1194_v31 = vcombine.low %v6815_v17, %v6818_v18  ;;  %v922_v32 = vcombine.low %v866_v19, %v882_v3  ;;  %v923_v33 = vcombine.high %v866_v19, %v882_v3  ;;  %v938_v34 = vcombine.low %v873_v20, %v889_v4 }
 0x172   :  { %v939_v35 = vcombine.high %v873_v20, %v889_v4  ;;  %v6832_v36 = vpop.permute.xlu0 %216  ;;  %v211_v38 = vpop.permute.xlu1 %210  ;;  %v623_v23 = vcombine.high %v6801_v59, %v6804_v60  ;;  %v1163_v39 = vcombine.high %v6809_v12, %v6812_v13  ;;  %v382_v43 = vrot.slane %v374_v21, %v6744_v37 }
 0x173   :  { %v390_v40 = vcombine.low %v199_v11, %v211_v38  ;;  %v391_v41 = vcombine.high %v199_v11, %v211_v38  ;;  %v6839_v22 = vrot.slane %v922_v32, %v6748_v44  ;;  %v6842_v42 = vrot.slane %v923_v33, %v6748_v44 }
 0x174   :  { %v389_v45 = vrot.slane %v375_v27, %v6744_v37  ;;  %v1170_v48 = vrot.slane %v1162_v30, %v6748_v44  ;;  %v1202_v53 = vrot.slane %v1194_v31, %v6748_v44  ;;  %v1195_v54 = vcombine.high %v6815_v17, %v6818_v18 }
 0x175   :  { %v398_v46 = vrot.slane %v390_v40, %v6744_v37  ;;  %v405_v47 = vrot.slane %v391_v41, %v6744_v37  ;;  %v6853_v55 = vrot.slane %v938_v34, %v6748_v44  ;;  %v6856_v56 = vrot.slane %v939_v35, %v6748_v44 }
 0x176   :  { %v5933_v57 = vcombine.low %v6839_v22, %v6842_v42  ;;  %v6860_v58 = vpop.permute.xlu1 %222  ;;  %v787_v61 = vpop.permute.xlu0 %786  ;;  %v5935_v2 = vcombine.high %v6839_v22, %v6842_v42  ;;  %v1226_v3 = vcombine.low %v1170_v48, %v1202_v53  ;;  %v582_v4 = vrot.slane %v574_v16, %v6748_v44 }
 0x177   :  { %v438_v62 = vcombine.low %v382_v43, %v398_v46  ;;  %v439_v63 = vcombine.high %v382_v43, %v398_v46  ;;  %v454_v0 = vcombine.low %v389_v45, %v405_v47  ;;  %v455_v1 = vcombine.high %v389_v45, %v405_v47 }
 0x178   :  { %v614_v8 = vrot.slane %v606_v50, %v6748_v44  ;;  %v5937_v13 = vcombine.low %v6853_v55, %v6856_v56  ;;  %v5939_v17 = vcombine.high %v6853_v55, %v6856_v56  ;;  %6145 = vmatpush3.xpose.msk.msra.mxu0 %vm1958_vm2, %v1226_v3  ;;  %v1227_v18 = vcombine.high %v1170_v48, %v1202_v53 }
 0x179   :  { %v446_v9 = vrot.slane %v438_v62, %v6748_v44  ;;  %v453_v10 = vrot.slane %v439_v63, %v6748_v44  ;;  %v462_v11 = vrot.slane %v454_v0, %v6748_v44  ;;  %v469_v12 = vrot.slane %v455_v1, %v6748_v44  ;;  %6149 = vmatprep.subr.mxu0 %v6556_v7 }
 0x17a   :  { %v638_v16 = vcombine.low %v582_v4, %v614_v8  ;;  %v793_v19 = vpop.permute.xlu1 %792  ;;  %v799_v50 = vpop.permute.xlu0 %798  ;;  %v6892_v40 = vrot.slane %v1163_v39, %v6748_v44  ;;  %v6895_v41 = vrot.slane %v1195_v54, %v6748_v44  ;;  %v639_v47 = vcombine.high %v582_v4, %v614_v8 }
 0x17b   :  { %v5924_v20 = vcombine.low %v446_v9, %v453_v10  ;;  %v5926_v21 = vcombine.high %v446_v9, %v453_v10  ;;  %v5928_v27 = vcombine.low %v462_v11, %v469_v12  ;;  %v5930_v30 = vcombine.high %v462_v11, %v469_v12 }
 0x17c   :  { %v962_v31 = vcombine.low %v6672_v24, %v793_v19  ;;  %v963_v32 = vcombine.high %v6672_v24, %v793_v19  ;;  %v978_v33 = vcombine.low %v787_v61, %v799_v50  ;;  %v979_v34 = vcombine.high %v787_v61, %v799_v50  ;;  %6147 = vmatmul.mubr.msk.f32.vlgmr.msra.gmra.mrb[6].mxu0 %vm1958_vm2, %v638_v16 }
 0x17d   :  { %v6885_v35 = vrot.slane %v5924_v20, %v6744_v37  ;;  %v6888_v38 = vrot.slane %v5926_v21, %v6744_v37  ;;  %6150 = vmatpush3.xpose.msk.msra.mxu0 %vm1958_vm2, %v1227_v18  ;;  %v6903_v45 = vrot.slane %v5928_v27, %v6744_v37  ;;  %v6906_v46 = vrot.slane %v5930_v30, %v6744_v37 }
 0x17e   :  { %v970_v24 = vrot.slane %v962_v31, %v6744_v37  ;;  %v977_v22 = vrot.slane %v963_v32, %v6744_v37  ;;  %v986_v42 = vrot.slane %v978_v33, %v6744_v37  ;;  %v993_v43 = vrot.slane %v979_v34, %v6744_v37  ;;  %6151 = vmatprep.mubr.msk.f32.mxu0 %vm6564_vm1, %v6556_v7  ;;  %v6912_v48 = vpop.permute.xlu1 %810  ;;  %v6915_v61 = vpop.permute.xlu0 %804 }
 0x17f   :  { %v710_v39 = vcombine.low %v6885_v35, %v6888_v38  ;;  %6154 = vmatprep.subr.mxu0 %v6556_v7  ;;  %v1228_v62 = vcombine.low %v6892_v40, %v6895_v41  ;;  %v1113_v63 = vrot.slane %v5933_v57, %v6744_v37  ;;  %v1129_v0 = vrot.slane %v5935_v2, %v6744_v37 }
 0x180   :  { %v1026_v53 = vcombine.low %v970_v24, %v986_v42  ;;  %v1027_v54 = vcombine.high %v970_v24, %v986_v42  ;;  %v1042_v55 = vcombine.low %v977_v22, %v993_v43  ;;  %v1043_v56 = vcombine.high %v977_v22, %v993_v43  ;;  %6152 = vmatmul.mubr.msk.f32.vlgmr.msra.gmra.mrb[8].mxu0 %vm1958_vm2, %v639_v47 }
 0x181   :  { %v1145_v1 = vrot.slane %v5937_v13, %v6744_v37  ;;  %6156 = vmatprep.mubr.msk.f32.mxu0 %vm6564_vm1, %v6556_v7  ;;  %v711_v10 = vcombine.high %v6885_v35, %v6888_v38  ;;  %6155 = vmatpush3.xpose.msk.msra.mxu0 %vm1958_vm2, %v1228_v62  ;;  %v1161_v57 = vrot.slane %v5939_v17, %v6744_v37 }
 0x182   :  { %v1034_v3 = vrot.slane %v1026_v53, %v6748_v44  ;;  %v1041_v4 = vrot.slane %v1027_v54, %v6748_v44  ;;  %v1050_v8 = vrot.slane %v1042_v55, %v6748_v44  ;;  %v1057_v9 = vrot.slane %v1043_v56, %v6748_v44  ;;  %6159 = vmatprep.subr.mxu0 %v6556_v7  ;;  %v823_v5 = vpop.permute.xlu1 %822  ;;  %v817_v30 = vpop.permute.xlu0 %816 }
 0x183   :  { %v1178_v2 = vcombine.low %v1113_v63, %v1129_v0  ;;  %v6937_v11 = vrot.slane %v575_v49, %v6748_v44  ;;  %v742_v19 = vcombine.low %v6903_v45, %v6906_v46  ;;  %v1210_v20 = vcombine.low %v1145_v1, %v1161_v57 }
 0x184   :  { %v5940_v12 = vcombine.low %v1034_v3, %v1041_v4  ;;  %v5942_v13 = vcombine.high %v1034_v3, %v1041_v4  ;;  %v5944_v16 = vcombine.low %v1050_v8, %v1057_v9  ;;  %v5946_v18 = vcombine.high %v1050_v8, %v1057_v9 }
 0x185   :  { %v1186_v50 = vrot.slane %v1178_v2, %v6748_v44  ;;  %v621_v17 = vrot.slane %v607_v28, %v6748_v44  ;;  %v1179_v21 = vcombine.high %v1113_v63, %v1129_v0  ;;  %v1211_v27 = vcombine.high %v1145_v1, %v1161_v57 }
 0x186   :  { %v6948_v6 = vrot.slane %v5940_v12, %v6744_v37  ;;  %v6951_v49 = vrot.slane %v5942_v13, %v6744_v37  ;;  %v1218_v31 = vrot.slane %v1210_v20, %v6748_v44  ;;  %v590_v33 = vcombine.low %v6791_v51, %v6794_v52  ;;  %v235_v3 = vpop.permute.xlu1 %234  ;;  %v229_v8 = vpop.permute.xlu0 %228 }
 0x187   :  { %v640_v32 = vcombine.low %v6937_v11, %v621_v17  ;;  %v622_v14 = vcombine.low %v6801_v59, %v6804_v60  ;;  %v743_v15 = vcombine.high %v6903_v45, %v6906_v46  ;;  %v6962_v28 = vrot.slane %v5944_v16, %v6744_v37 }
 0x188   :  { %v6965_v34 = vrot.slane %v5946_v18, %v6744_v37  ;;  %v1298_v24 = vcombine.low %v6948_v6, %v6951_v49  ;;  %v1230_v22 = vcombine.low %v1186_v50, %v1218_v31  ;;  %v1231_v42 = vcombine.high %v1186_v50, %v1218_v31 }
 0x189   :  { %6157 = vmatmul.mubr.msk.f32.vlgmr.msra.gmra.mrb[10].mxu0 %vm1958_vm2, %v640_v32  ;;  %v598_v43 = vrot.slane %v590_v33, %v6748_v44  ;;  %v630_v47 = vrot.slane %v622_v14, %v6748_v44  ;;  %v1229_v53 = vcombine.high %v6892_v40, %v6895_v41  ;;  %v1193_v54 = vrot.slane %v1179_v21, %v6748_v44 }
 0x18a   :  { %v1225_v55 = vrot.slane %v1211_v27, %v6748_v44  ;;  %v1010_v56 = vcombine.low %v6912_v48, %v823_v5  ;;  %6161 = vmatprep.mubr.msk.f32.mxu0 %vm6564_vm1, %v6556_v7  ;;  %6165 = vmatpush3.xpose.msk.msra.mxu1 %vm1958_vm2, %v1230_v22  ;;  %v1011_v0 = vcombine.high %v6912_v48, %v823_v5  ;;  %v1373_v45 = vpop.permute.xlu1 %1372  ;;  %v1379_v46 = vpop.permute.xlu0 %1378 }
 0x18b   :  { %v642_v62 = vcombine.low %v598_v43, %v630_v47  ;;  %v643_v63 = vcombine.high %v598_v43, %v630_v47  ;;  %v994_v1 = vcombine.low %v6915_v61, %v817_v30  ;;  %6174 = vmatprep.subr.mxu1 %v6556_v7  ;;  %6160 = vmatpush3.xpose.msk.msra.mxu0 %vm1958_vm2, %v1229_v53 }
 0x18c   :  { %v1232_v40 = vcombine.low %v1193_v54, %v1225_v55  ;;  %v1018_v41 = vrot.slane %v1010_v56, %v6744_v37  ;;  %v995_v4 = vcombine.high %v6915_v61, %v817_v30  ;;  %v1025_v9 = vrot.slane %v1011_v0, %v6744_v37  ;;  %6169 = vmatprep.subr.mxu0 %v6556_v7 }
 0x18d   :  { %v1002_v57 = vrot.slane %v994_v1, %v6744_v37  ;;  %v641_v2 = vcombine.high %v6937_v11, %v621_v17  ;;  %v6994_v48 = vrot.slane %v591_v29, %v6748_v44  ;;  %6167 = vmatmul.mubr.msk.f32.vlgmr.msra.gmra.mrb[0].mxu1 %vm1958_vm2, %v642_v62  ;;  %v7002_v61 = vrot.slane %v623_v23, %v6748_v44 }
 0x18e   :  { %v1009_v12 = vrot.slane %v995_v4, %v6744_v37  ;;  %v422_v11 = vcombine.low %v6860_v58, %v235_v3  ;;  %v423_v13 = vcombine.high %v6860_v58, %v235_v3  ;;  %6175 = vmatpush3.xpose.msk.msra.mxu1 %vm1958_vm2, %v1232_v40  ;;  %6176 = vmatprep.mubr.msk.f32.mxu1 %vm6564_vm1, %v6556_v7 }
 0x18f   :  { %v1058_v16 = vcombine.low %v1002_v57, %v1018_v41  ;;  %v1059_v51 = vcombine.high %v1002_v57, %v1018_v41  ;;  %v406_v52 = vcombine.low %v6832_v36, %v229_v8  ;;  %6162 = vmatmul.mubr.msk.f32.vlgmr.msra.gmra.mrb[12].mxu0 %vm1958_vm2, %v641_v2  ;;  %v644_v59 = vcombine.low %v6994_v48, %v7002_v61 }
 0x190   :  { %v1074_v29 = vcombine.low %v1009_v12, %v1025_v9  ;;  %v1075_v18 = vcombine.high %v1009_v12, %v1025_v9  ;;  %v430_v60 = vrot.slane %v422_v11, %v6744_v37  ;;  %6170 = vmatpush3.xpose.msk.msra.mxu0 %vm1958_vm2, %v1231_v42  ;;  %v437_v50 = vrot.slane %v423_v13, %v6744_v37 }
 0x191   :  { %v1066_v23 = vrot.slane %v1058_v16, %v6748_v44  ;;  %v1073_v58 = vrot.slane %v1059_v51, %v6748_v44  ;;  %v407_v20 = vcombine.high %v6832_v36, %v229_v8  ;;  %6177 = vmatmul.mubr.msk.f32.vlgmr.msra.gmra.mrb[2].mxu1 %vm1958_vm2, %v644_v59  ;;  %v414_v21 = vrot.slane %v406_v52, %v6744_v37 }
 0x192   :  { %v1082_v17 = vrot.slane %v1074_v29, %v6748_v44  ;;  %v1089_v5 = vrot.slane %v1075_v18, %v6748_v44  ;;  %6171 = vmatprep.mubr.msk.f32.mxu0 %vm6564_vm1, %v6556_v7  ;;  %6179 = vmatprep.subr.mxu0 %v6556_v7  ;;  %v1233_v32 = vcombine.high %v1193_v54, %v1225_v55 }
 0x193   :  { %v5941_v27 = vcombine.low %v1066_v23, %v1073_v58  ;;  %v5943_v30 = vcombine.high %v1066_v23, %v1073_v58  ;;  %v421_v31 = vrot.slane %v407_v20, %v6744_v37  ;;  %v470_v14 = vcombine.low %v414_v21, %v430_v60  ;;  %6172 = vmatmul.mubr.msk.f32.vlgmr.msra.gmra.mrb[14].mxu0 %vm1958_vm2, %v643_v63 }
 0x194   :  { %v5945_v33 = vcombine.low %v1082_v17, %v1089_v5  ;;  %v5947_v36 = vcombine.high %v1082_v17, %v1089_v5  ;;  %v471_v22 = vcombine.high %v414_v21, %v430_v60  ;;  %6180 = vmatpush3.xpose.msk.msra.mxu0 %vm1958_vm2, %v1233_v32  ;;  %v1299_v56 = vcombine.high %v6948_v6, %v6951_v49 }
 0x195   :  { %v7029_v42 = vrot.slane %v5941_v27, %v6744_v37  ;;  %v7032_v43 = vrot.slane %v5943_v30, %v6744_v37  ;;  %v486_v47 = vcombine.low %v421_v31, %v437_v50  ;;  %v487_v53 = vcombine.high %v421_v31, %v437_v50  ;;  %6181 = vmatprep.mubr.msk.f32.mxu0 %vm6564_vm1, %v6556_v7 }
 0x196   :  { %v1330_v54 = vcombine.low %v6962_v28, %v6965_v34  ;;  %v478_v55 = vrot.slane %v470_v14, %v6748_v44  ;;  %v485_v62 = vrot.slane %v471_v22, %v6748_v44  ;;  %v7044_v63 = vrot.slane %v5945_v33, %v6744_v37  ;;  %6184 = vmatprep.subr.mxu1 %v6556_v7 }
 0x197   :  { %v1297_v0 = vrot.slane %v5947_v36, %v6744_v37  ;;  %v494_v1 = vrot.slane %v486_v47, %v6748_v44  ;;  %v501_v3 = vrot.slane %v487_v53, %v6748_v44  ;;  %v1331_v40 = vcombine.high %v6962_v28, %v6965_v34  ;;  %6189 = vmatprep.subr.mxu0 %v6556_v7  ;;  %v1385_v47 = vpop.permute.xlu1 %1384 }
 0x198   :  { %v1314_v41 = vcombine.low %v7029_v42, %v7032_v43  ;;  %v5925_v4 = vcombine.low %v478_v55, %v485_v62  ;;  %v5927_v8 = vcombine.high %v478_v55, %v485_v62  ;;  %v645_v2 = vcombine.high %v6994_v48, %v7002_v61  ;;  %6186 = vmatprep.mubr.msk.f32.mxu1 %vm6564_vm1, %v6556_v7 }
 0x199   :  { %v5929_v9 = vcombine.low %v494_v1, %v501_v3  ;;  %v5931_v57 = vcombine.high %v494_v1, %v501_v3  ;;  %v1306_v12 = vrot.slane %v1298_v24, %v6748_v44  ;;  %v1338_v11 = vrot.slane %v1330_v54, %v6748_v44 }
 0x19a   :  { %v661_v28 = vrot.slane %v5925_v4, %v6744_v37  ;;  %v677_v34 = vrot.slane %v5927_v8, %v6744_v37  ;;  %v718_v13 = vrot.slane %v710_v39, %v6748_v44  ;;  %v1346_v48 = vcombine.low %v7044_v63, %v1297_v0  ;;  %6182 = vmatmul.mubr.msk.f32.vlgmr.msra.gmra.mrb[16].mxu0 %vm1958_vm2, %v645_v2 }
 0x19b   :  { %v693_v61 = vrot.slane %v5929_v9, %v6744_v37  ;;  %v709_v6 = vrot.slane %v5931_v57, %v6744_v37  ;;  %v750_v49 = vrot.slane %v742_v19, %v6748_v44  ;;  %v1315_v24 = vcombine.high %v7029_v42, %v7032_v43  ;;  %6191 = vmatprep.mubr.msk.f32.mxu0 %vm6564_vm1, %v6556_v7 }
 0x19c   :  { %v1362_v16 = vcombine.low %v1306_v12, %v1338_v11  ;;  %v1363_v51 = vcombine.high %v1306_v12, %v1338_v11  ;;  %v1313_v39 = vrot.slane %v1299_v56, %v6748_v44  ;;  %v1347_v52 = vcombine.high %v7044_v63, %v1297_v0 }
 0x19d   :  { %v726_v29 = vcombine.low %v661_v28, %v677_v34  ;;  %v758_v18 = vcombine.low %v693_v61, %v709_v6  ;;  %v774_v59 = vcombine.low %v718_v13, %v750_v49  ;;  %v1345_v19 = vrot.slane %v1331_v40, %v6748_v44 }
 0x19e   :  { %6185 = vmatpush3.xpose.msk.msra.mxu1 %vm1958_vm2, %v1362_v16  ;;  %6190 = vmatpush3.xpose.msk.msra.mxu0 %vm1958_vm2, %v1363_v51  ;;  %v725_v60 = vrot.slane %v711_v10, %v6748_v44  ;;  %v757_v23 = vrot.slane %v743_v15, %v6748_v44  ;;  %v775_v58 = vcombine.high %v718_v13, %v750_v49 }
 0x19f   :  { %6194 = vmatprep.subr.mxu1 %v6556_v7  ;;  %6199 = vmatprep.subr.mxu0 %v6556_v7  ;;  %v1322_v50 = vrot.slane %v1314_v41, %v6748_v44  ;;  %v1354_v20 = vrot.slane %v1346_v48, %v6748_v44  ;;  %v727_v17 = vcombine.high %v661_v28, %v677_v34 }
 0x1a0   :  { %v1364_v5 = vcombine.low %v1313_v39, %v1345_v19  ;;  %v1365_v21 = vcombine.high %v1313_v39, %v1345_v19  ;;  %v759_v27 = vcombine.high %v693_v61, %v709_v6  ;;  %v734_v35 = vrot.slane %v726_v29, %v6748_v44 }
 0x1a1   :  { %6187 = vmatmul.mubr.msk.f32.vlgmr.msra.gmra.mrb[4].mxu1 %vm1958_vm2, %v774_v59  ;;  %6192 = vmatmul.mubr.msk.f32.vlgmr.msra.gmra.mrb[18].mxu0 %vm1958_vm2, %v775_v58  ;;  %v766_v38 = vrot.slane %v758_v18, %v6748_v44  ;;  %v776_v10 = vcombine.low %v725_v60, %v757_v23  ;;  %v1366_v15 = vcombine.low %v1322_v50, %v1354_v20 }
 0x1a2   :  { %6195 = vmatpush3.xpose.msk.msra.mxu1 %vm1958_vm2, %v1364_v5  ;;  %6200 = vmatpush3.xpose.msk.msra.mxu0 %vm1958_vm2, %v1365_v21  ;;  %v1367_v30 = vcombine.high %v1322_v50, %v1354_v20  ;;  %v777_v31 = vcombine.high %v725_v60, %v757_v23  ;;  %v1329_v32 = vrot.slane %v1315_v24, %v6748_v44  ;;  %v1391_v20 = vpop.permute.xlu0 %1390 }
 0x1a3   :  { %6196 = vmatprep.mubr.msk.f32.mxu1 %vm6564_vm1, %v6556_v7  ;;  %6201 = vmatprep.mubr.msk.f32.mxu0 %vm6564_vm1, %v6556_v7  ;;  %v1361_v33 = vrot.slane %v1347_v52, %v6748_v44  ;;  %v741_v36 = vrot.slane %v727_v17, %v6748_v44  ;;  %v1414_v14 = vcombine.low %v6728_v26, %v1379_v46  ;;  %v1397_v17 = vpop.permute.xlu1 %1396 }
 0x1a4   :  { %6204 = vmatprep.subr.mxu1 %v6556_v7  ;;  %6209 = vmatprep.subr.mxu0 %v6556_v7  ;;  %v778_v22 = vcombine.low %v734_v35, %v766_v38  ;;  %v779_v42 = vcombine.high %v734_v35, %v766_v38  ;;  %v1415_v43 = vcombine.high %v6728_v26, %v1379_v46 }
 0x1a5   :  { %6197 = vmatmul.mubr.msk.f32.vlgmr.msra.gmra.mrb[6].mxu1 %vm1958_vm2, %v776_v10  ;;  %6202 = vmatmul.mubr.msk.f32.vlgmr.msra.gmra.mrb[20].mxu0 %vm1958_vm2, %v777_v31  ;;  %v1422_v53 = vrot.slane %v1414_v14, %v6744_v37  ;;  %v1430_v56 = vcombine.low %v1373_v45, %v1385_v47  ;;  %v1431_v54 = vcombine.high %v1373_v45, %v1385_v47 }
 0x1a6   :  { %6205 = vmatpush3.xpose.msk.msra.mxu1 %vm1958_vm2, %v1366_v15  ;;  %6210 = vmatpush3.xpose.msk.msra.mxu0 %vm1958_vm2, %v1367_v30  ;;  %v1368_v55 = vcombine.low %v1329_v32, %v1361_v33  ;;  %v773_v62 = vrot.slane %v759_v27, %v6748_v44  ;;  %v1429_v26 = vrot.slane %v1415_v43, %v6744_v37  ;;  %v1409_v5 = vpop.permute.xlu0 %1408 }
 0x1a7   :  { %6206 = vmatprep.mubr.msk.f32.mxu1 %vm6564_vm1, %v6556_v7  ;;  %6211 = vmatprep.mubr.msk.f32.mxu0 %vm6564_vm1, %v6556_v7  ;;  %v1369_v63 = vcombine.high %v1329_v32, %v1361_v33  ;;  %v1438_v0 = vrot.slane %v1430_v56, %v6744_v37  ;;  %v1445_v1 = vrot.slane %v1431_v54, %v6744_v37  ;;  %v1403_v21 = vpop.permute.xlu1 %1402 }
 0x1a8   :  { %6214 = vmatprep.subr.mxu1 %v6556_v7  ;;  %6219 = vmatprep.subr.mxu0 %v6556_v7  ;;  %v780_v4 = vcombine.low %v741_v36, %v773_v62  ;;  %v781_v8 = vcombine.high %v741_v36, %v773_v62  ;;  %v1462_v27 = vcombine.low %v1397_v17, %v1409_v5 }
 0x1a9   :  { %6207 = vmatmul.mubr.msk.f32.vlgmr.msra.gmra.mrb[8].mxu1 %vm1958_vm2, %v778_v22  ;;  %6212 = vmatmul.mubr.msk.f32.vlgmr.msra.gmra.mrb[22].mxu0 %vm1958_vm2, %v779_v42  ;;  %v1478_v3 = vcombine.low %v1422_v53, %v1438_v0  ;;  %v1479_v40 = vcombine.high %v1422_v53, %v1438_v0  ;;  %v1494_v41 = vcombine.low %v1429_v26, %v1445_v1 }
 0x1aa   :  { %6215 = vmatpush3.xpose.msk.msra.mxu1 %vm1958_vm2, %v1368_v55  ;;  %6220 = vmatpush3.xpose.msk.msra.mxu0 %vm1958_vm2, %v1369_v63  ;;  %v1495_v9 = vcombine.high %v1429_v26, %v1445_v1  ;;  %v1463_v35 = vcombine.high %v1397_v17, %v1409_v5  ;;  %v1446_v38 = vcombine.low %v1391_v20, %v1403_v21 }
 0x1ab   :  { %6216 = vmatprep.mubr.msk.f32.mxu1 %vm6564_vm1, %v6556_v7  ;;  %6221 = vmatprep.mubr.msk.f32.mxu0 %vm6564_vm1, %v6556_v7  ;;  %v1486_v57 = vrot.slane %v1478_v3, %v6748_v44  ;;  %v1493_v2 = vrot.slane %v1479_v40, %v6748_v44  ;;  %v1502_v12 = vrot.slane %v1494_v41, %v6748_v44 }
 0x1ac   :  { %6224 = vmatprep.subr.mxu1 %v6556_v7  ;;  %6229 = vmatprep.subr.mxu0 %v6556_v7  ;;  %v1509_v28 = vrot.slane %v1495_v9, %v6748_v44  ;;  %v1447_v45 = vcombine.high %v1391_v20, %v1403_v21  ;;  %v1470_v46 = vrot.slane %v1462_v27, %v6744_v37 }
 0x1ad   :  { %6217 = vmatmul.mubr.msk.f32.vlgmr.msra.gmra.mrb[10].mxu1 %vm1958_vm2, %v780_v4  ;;  %6222 = vmatmul.mubr.msk.f32.vlgmr.msra.gmra.mrb[24].mxu0 %vm1958_vm2, %v781_v8  ;;  %v5948_v34 = vcombine.low %v1486_v57, %v1493_v2  ;;  %v5950_v11 = vcombine.high %v1486_v57, %v1493_v2  ;;  %v1477_v10 = vrot.slane %v1463_v35, %v6744_v37 }
 0x1ae   :  { %6226 = vmatprep.mubr.msk.f32.mxu1 %vm6564_vm1, %v6556_v7  ;;  %6231 = vmatprep.mubr.msk.f32.mxu0 %vm6564_vm1, %v6556_v7  ;;  %v5952_v13 = vcombine.low %v1502_v12, %v1509_v28  ;;  %v5954_v48 = vcombine.high %v1502_v12, %v1509_v28  ;;  %v1454_v15 = vrot.slane %v1446_v38, %v6744_v37 }
 0x1af   :  { %v1694_v61 = vrot.slane %v5948_v34, %v6744_v37  ;;  %v1710_v6 = vrot.slane %v5950_v11, %v6744_v37  ;;  %v1461_v30 = vrot.slane %v1447_v45, %v6744_v37 }
 0x1b0   :  { %v1726_v49 = vrot.slane %v5952_v13, %v6744_v37  ;;  %v1742_v24 = vrot.slane %v5954_v48, %v6744_v37  ;;  %v1510_v31 = vcombine.low %v1454_v15, %v1470_v46  ;;  %v1511_v32 = vcombine.high %v1454_v15, %v1470_v46 }
 0x1b1   :  { %v1750_v16 = vcombine.low %v1694_v61, %v1710_v6  ;;  %v1751_v59 = vcombine.high %v1694_v61, %v1710_v6  ;;  %v1526_v33 = vcombine.low %v1461_v30, %v1477_v10  ;;  %v1527_v36 = vcombine.high %v1461_v30, %v1477_v10 }
 0x1b2   :  { %v1782_v51 = vcombine.low %v1726_v49, %v1742_v24  ;;  %v1783_v19 = vcombine.high %v1726_v49, %v1742_v24  ;;  %v1518_v14 = vrot.slane %v1510_v31, %v6748_v44  ;;  %v1525_v22 = vrot.slane %v1511_v32, %v6748_v44 }
 0x1b3   :  { %v1758_v39 = vrot.slane %v1750_v16, %v6748_v44  ;;  %v7160_v60 = vrot.slane %v1751_v59, %v6748_v44  ;;  %v1534_v42 = vrot.slane %v1526_v33, %v6748_v44  ;;  %v1541_v43 = vrot.slane %v1527_v36, %v6748_v44 }
 0x1b4   :  { %v1790_v52 = vrot.slane %v1782_v51, %v6748_v44  ;;  %v7163_v23 = vrot.slane %v1783_v19, %v6748_v44  ;;  %v5949_v47 = vcombine.low %v1518_v14, %v1525_v22  ;;  %v5951_v53 = vcombine.high %v1518_v14, %v1525_v22 }
 0x1b5   :  { %v5953_v56 = vcombine.low %v1534_v42, %v1541_v43  ;;  %v5955_v54 = vcombine.high %v1534_v42, %v1541_v43 }
 0x1b6   :  { %v1814_v29 = vcombine.low %v1758_v39, %v1790_v52  ;;  %v1815_v18 = vcombine.high %v1758_v39, %v1790_v52  ;;  %v1816_v58 = vcombine.low %v7160_v60, %v7163_v23  ;;  %v1817_v50 = vcombine.high %v7160_v60, %v7163_v23 }
 0x1b7   :  { %v1701_v55 = vrot.slane %v5949_v47, %v6744_v37  ;;  %v1717_v62 = vrot.slane %v5951_v53, %v6744_v37  ;;  %v1733_v26 = vrot.slane %v5953_v56, %v6744_v37  ;;  %v1749_v63 = vrot.slane %v5955_v54, %v6744_v37 }
 0x1b8   :  { %6225 = vmatpush3.msra.mxu1 %v1814_v29  ;;  %6230 = vmatpush3.msra.mxu0 %v1815_v18 }
 0x1b9   :  { %6234 = vmatprep.subr.mxu1 %v6556_v7  ;;  %6239 = vmatprep.subr.mxu0 %v6556_v7  ;;  %v1766_v41 = vcombine.low %v1701_v55, %v1717_v62  ;;  %v1798_v4 = vcombine.low %v1733_v26, %v1749_v63  ;;  %v1767_v8 = vcombine.high %v1701_v55, %v1717_v62 }
 0x1ba   :  { %v1799_v57 = vcombine.high %v1733_v26, %v1749_v63 }
 0x1bb   :  { %v7186_v12 = vrot.slane %v1766_v41, %v6748_v44  ;;  %v7189_v28 = vrot.slane %v1798_v4, %v6748_v44  ;;  %v7192_v34 = vrot.slane %v1767_v8, %v6748_v44 }
 0x1bc   :  { %v7195_v11 = vrot.slane %v1799_v57, %v6748_v44 }
 0x1bd   :  { %v1818_v13 = vcombine.low %v7186_v12, %v7189_v28  ;;  %v1819_v48 = vcombine.high %v7186_v12, %v7189_v28 }
 0x1be   :  { %v1820_v61 = vcombine.low %v7192_v34, %v7195_v11  ;;  %v1821_v6 = vcombine.high %v7192_v34, %v7195_v11 }
 0x24f   :  { %v2031_v0 = vpop.f32.mrb[6].mxu0 }
 0x250   :  { %v7181_v1 = vmul.f32 0.25, %v2031_v0  ;;  %v6148_v3 = vpop.f32.mrb[7].mxu0 }
 0x252   :  { %v3192_v40 = vsel %vm3191_vm3, %v7181_v1, -inf }
 0x253   :  { %3193 = vmax.xlane.f32.xlu0 %v3192_v40  ;;  %v2107_v9 = vpop.f32.mrb[8].mxu0 }
 0x254   :  { %v6153_v2 = vpop.f32.mrb[9].mxu0  ;;  %v7211_v59 = vmul.f32 0.25, %v2107_v9 }
 0x256   :  { %v3195_v45 = vsel %vm3191_vm3, %v7211_v59, -inf }
 0x25c   :  { %v2183_v49 = vpop.f32.mrb[10].mxu0 }
 0x25d   :  { %v7205_v24 = vmul.f32 0.25, %v2183_v49  ;;  %v6158_v16 = vpop.f32.mrb[11].mxu0 }
 0x25f   :  { %v3198_v51 = vsel %vm3191_vm3, %v7205_v24, -inf }
 0x260   :  { %3199 = vmax.xlane.f32.xlu0 %v3198_v51  ;;  %v2335_v39 = vpop.f32.mrb[0].mxu1 }
 0x261   :  { %v7209_v52 = vmul.f32 0.25, %v2335_v39  ;;  %v6168_v29 = vpop.f32.mrb[1].mxu1 }
 0x262   :  { %v2259_v18 = vpop.f32.mrb[12].mxu0 }
 0x263   :  { %v3204_v19 = vsel %vm3191_vm3, %v7209_v52, -inf  ;;  %v7215_v20 = vmul.f32 0.25, %v2259_v18  ;;  %v6163_v17 = vpop.f32.mrb[13].mxu0 }
 0x264   :  { %v2487_v5 = vpop.f32.mrb[2].mxu1  ;;  %3205 = vmax.xlane.f32.xlu1 %v3204_v19 }
 0x265   :  { %v6178_v21 = vpop.f32.mrb[3].mxu1  ;;  %v3201_v27 = vsel %vm3191_vm3, %v7215_v20, -inf  ;;  %v7219_v38 = vmul.f32 0.25, %v2487_v5 }
 0x266   :  { %3202 = vmax.xlane.f32.xlu0 %v3201_v27  ;;  %v2411_v35 = vpop.f32.mrb[14].mxu0 }
 0x267   :  { %v7223_v46 = vmul.f32 0.25, %v2411_v35  ;;  %v6173_v10 = vpop.f32.mrb[15].mxu0  ;;  %v3210_v30 = vsel %vm3191_vm3, %v7219_v38, -inf }
 0x268   :  { %3196 = vmax.xlane.f32.xlu1 %v3195_v45 }
 0x269   :  { %v3207_v15 = vsel %vm3191_vm3, %v7223_v46, -inf }
 0x26a   :  { %3208 = vmax.xlane.f32.xlu0 %v3207_v15 }
 0x26c   :  { %3211 = vmax.xlane.f32.xlu1 %v3210_v30 }
 0x26d   :  { %v2563_v31 = vpop.f32.mrb[16].mxu0 }
 0x26e   :  { %v7229_v32 = vmul.f32 0.25, %v2563_v31  ;;  %v6183_v33 = vpop.f32.mrb[17].mxu0 }
 0x270   :  { %v3213_v36 = vsel %vm3191_vm3, %v7229_v32, -inf }
 0x271   :  { %3214 = vmax.xlane.f32.xlu0 %v3213_v36 }
 0x274   :  { %v2639_v14 = vpop.f32.mrb[4].mxu1  ;;  %v2715_v22 = vpop.f32.mrb[18].mxu0 }
 0x275   :  { %v7233_v42 = vmul.f32 0.25, %v2639_v14  ;;  %v7235_v43 = vmul.f32 0.25, %v2715_v22  ;;  %v6188_v47 = vpop.f32.mrb[5].mxu1  ;;  %v6193_v53 = vpop.f32.mrb[19].mxu0 }
 0x277   :  { %v3216_v56 = vsel %vm3191_vm3, %v7233_v42, -inf  ;;  %v3219_v54 = vsel %vm3191_vm3, %v7235_v43, -inf }
 0x278   :  { %v2791_v55 = vpop.f32.mrb[6].mxu1  ;;  %3217 = vmax.xlane.f32.xlu1 %v3216_v56  ;;  %3220 = vmax.xlane.f32.xlu0 %v3219_v54  ;;  %v2867_v62 = vpop.f32.mrb[20].mxu0 }
 0x279   :  { %v7241_v26 = vmul.f32 0.25, %v2791_v55  ;;  %v7243_v63 = vmul.f32 0.25, %v2867_v62  ;;  %v6198_v0 = vpop.f32.mrb[7].mxu1  ;;  %v6203_v3 = vpop.f32.mrb[21].mxu0 }
 0x27b   :  { %v3222_v40 = vsel %vm3191_vm3, %v7241_v26, -inf  ;;  %v3225_v41 = vsel %vm3191_vm3, %v7243_v63, -inf }
 0x27c   :  { %3223 = vmax.xlane.f32.xlu1 %v3222_v40  ;;  %3226 = vmax.xlane.f32.xlu0 %v3225_v41  ;;  %v2943_v4 = vpop.f32.mrb[8].mxu1  ;;  %v3019_v8 = vpop.f32.mrb[22].mxu0 }
 0x27d   :  { %v7249_v9 = vmul.f32 0.25, %v2943_v4  ;;  %v7251_v57 = vmul.f32 0.25, %v3019_v8  ;;  %v6208_v2 = vpop.f32.mrb[9].mxu1  ;;  %v6213_v49 = vpop.f32.mrb[23].mxu0 }
 0x27f   :  { %v3228_v16 = vsel %vm3191_vm3, %v7249_v9, -inf  ;;  %v3231_v51 = vsel %vm3191_vm3, %v7251_v57, -inf }
 0x280   :  { %v3095_v39 = vpop.f32.mrb[10].mxu1  ;;  %3229 = vmax.xlane.f32.xlu1 %v3228_v16  ;;  %3232 = vmax.xlane.f32.xlu0 %v3231_v51  ;;  %v3171_v29 = vpop.f32.mrb[24].mxu0 }
 0x281   :  { %v7257_v18 = vmul.f32 0.25, %v3095_v39  ;;  %v7259_v19 = vmul.f32 0.25, %v3171_v29  ;;  %v6218_v17 = vpop.f32.mrb[11].mxu1  ;;  %v6223_v5 = vpop.f32.mrb[25].mxu0 }
 0x283   :  { %v3234_v21 = vsel %vm3191_vm3, %v7257_v18, -inf  ;;  %v3237_v27 = vsel %vm3191_vm3, %v7259_v19, -inf }
 0x284   :  { %3235 = vmax.xlane.f32.xlu1 %v3234_v21  ;;  %3238 = vmax.xlane.f32.xlu0 %v3237_v27 }
 0x295   :  { %1380 = vrot.lane.b32.xlu1 %v6726_v25, %s6557_s1 }
 0x299   :  { %1386 = vrot.lane.b32.xlu1 %v6726_v25, %s6560_s22 }
 0x29a   :  { %1374 = vrot.lane.b32.xlu0 %v6726_v25, %s6558_s21 }
 0x29d   :  { %1392 = vrot.lane.b32.xlu1 %v6726_v25, %s6559_s0 }
 0x2e0   :  { %v3194_v35 = vpop.xlane.xlu0 %3193 }
 0x2e1   :  { %v3240_v45 = vsub.f32 %v7181_v1, %v3194_v35 }
 0x2e3   :  { %v3256_v10 = vmul.f32 1.442695, %v3240_v45 }
 0x2e5   :  { %6444 = vpow2.f32 %v3256_v10 }
 0x2ed   :  { %v3200_v15 = vpop.xlane.xlu0 %3199 }
 0x2ee   :  { %v3242_v31 = vsub.f32 %v7205_v24, %v3200_v15 }
 0x2ef   :  { %v7274_v30 = vpop.eup %6444 }
 0x2f0   :  { %v3288_v33 = vsel %vm3191_vm3, %v7274_v30, 0.0  ;;  %v3260_v53 = vmul.f32 1.442695, %v3242_v31 }
 0x2f1   :  { %v3206_v36 = vpop.xlane.xlu1 %3205  ;;  %3289 = vadd.xlane.f32.xlu1 %v3288_v33 }
 0x2f2   :  { %v3244_v14 = vsub.f32 %v7209_v52, %v3206_v36 }
 0x2f3   :  { %v3203_v22 = vpop.xlane.xlu0 %3202 }
 0x2f4   :  { %v3264_v47 = vmul.f32 1.442695, %v3244_v14  ;;  %v3243_v55 = vsub.f32 %v7215_v20, %v3203_v22 }
 0x2f5   :  { %v3197_v56 = vpop.xlane.xlu1 %3196 }
 0x2f6   :  { %6446 = vpow2.f32 %v3264_v47  ;;  %v3241_v1 = vsub.f32 %v7211_v59, %v3197_v56  ;;  %v3262_v3 = vmul.f32 1.442695, %v3243_v55 }
 0x2f7   :  { %6448 = vpow2.f32 %v3260_v53  ;;  %v3209_v62 = vpop.xlane.xlu0 %3208 }
 0x2f8   :  { %v3258_v54 = vmul.f32 1.442695, %v3241_v1 }
 0x2f9   :  { %v3212_v24 = vpop.xlane.xlu1 %3211 }
 0x2fa   :  { %6450 = vpow2.f32 %v3258_v54  ;;  %v3246_v0 = vsub.f32 %v7219_v38, %v3212_v24 }
 0x2fc   :  { %v3268_v40 = vmul.f32 1.442695, %v3246_v0 }
 0x2fe   :  { %6452 = vpow2.f32 %v3268_v40  ;;  %v3215_v52 = vpop.xlane.xlu0 %3214 }
 0x2ff   :  { %6454 = vpow2.f32 %v3262_v3  ;;  %v3247_v20 = vsub.f32 %v7229_v32, %v3215_v52  ;;  %v3245_v32 = vsub.f32 %v7223_v46, %v3209_v62 }
 0x300   :  { %v7283_v41 = vpop.eup %6446 }
 0x301   :  { %v3300_v4 = vsel %vm3191_vm3, %v7283_v41, 0.0  ;;  %v7287_v59 = vpop.eup %6448  ;;  %v3270_v39 = vmul.f32 1.442695, %v3247_v20  ;;  %v3266_v31 = vmul.f32 1.442695, %v3245_v32 }
 0x302   :  { %3301 = vadd.xlane.f32.xlu1 %v3300_v4  ;;  %v3294_v16 = vsel %vm3191_vm3, %v7287_v59, 0.0 }
 0x304   :  { %v7290_v8 = vpop.eup %6450 }
 0x305   :  { %v3218_v2 = vpop.xlane.xlu1 %3217  ;;  %v3221_v49 = vpop.xlane.xlu0 %3220  ;;  %v3291_v51 = vsel %vm3191_vm3, %v7290_v8, 0.0 }
 0x306   :  { %v3248_v38 = vsub.f32 %v7233_v42, %v3218_v2  ;;  %3295 = vadd.xlane.f32.xlu1 %v3294_v16  ;;  %3292 = vadd.xlane.f32.xlu0 %v3291_v51  ;;  %v3249_v1 = vsub.f32 %v7235_v43, %v3221_v49 }
 0x308   :  { %v3272_v29 = vmul.f32 1.442695, %v3248_v38  ;;  %v7297_v17 = vpop.eup %6452  ;;  %v3274_v24 = vmul.f32 1.442695, %v3249_v1 }
 0x309   :  { %v3224_v5 = vpop.xlane.xlu1 %3223  ;;  %v3227_v21 = vpop.xlane.xlu0 %3226  ;;  %v3306_v35 = vsel %vm3191_vm3, %v7297_v17, 0.0 }
 0x30a   :  { %6456 = vpow2.f32 %v3272_v29  ;;  %v3250_v27 = vsub.f32 %v7241_v26, %v3224_v5  ;;  %v3251_v42 = vsub.f32 %v7243_v63, %v3227_v21  ;;  %v7304_v45 = vpop.eup %6454  ;;  %3307 = vadd.xlane.f32.xlu0 %v3306_v35 }
 0x30b   :  { %6458 = vpow2.f32 %v3270_v39  ;;  %v3297_v26 = vsel %vm3191_vm3, %v7304_v45, 0.0 }
 0x30c   :  { %v3276_v10 = vmul.f32 1.442695, %v3250_v27  ;;  %v3278_v15 = vmul.f32 1.442695, %v3251_v42 }
 0x30d   :  { %v3230_v33 = vpop.xlane.xlu1 %3229  ;;  %v3233_v36 = vpop.xlane.xlu0 %3232 }
 0x30e   :  { %6460 = vpow2.f32 %v3276_v10  ;;  %v3252_v46 = vsub.f32 %v7249_v9, %v3230_v33  ;;  %v3253_v14 = vsub.f32 %v7251_v57, %v3233_v36  ;;  %3298 = vadd.xlane.f32.xlu0 %v3297_v26 }
 0x30f   :  { %6462 = vpow2.f32 %v3278_v15 }
 0x310   :  { %v3282_v63 = vmul.f32 1.442695, %v3253_v14  ;;  %6464 = vpow2.f32 %v3266_v31  ;;  %v3280_v22 = vmul.f32 1.442695, %v3252_v46 }
 0x311   :  { %v3236_v47 = vpop.xlane.xlu1 %3235  ;;  %v3239_v55 = vpop.xlane.xlu0 %3238 }
 0x312   :  { %v3254_v53 = vsub.f32 %v7257_v18, %v3236_v47  ;;  %6466 = vpow2.f32 %v3282_v63  ;;  %v3255_v18 = vsub.f32 %v7259_v19, %v3239_v55 }
 0x313   :  { %6468 = vpow2.f32 %v3280_v22 }
 0x314   :  { %v7311_v56 = vpop.eup %6456  ;;  %v3284_v9 = vmul.f32 1.442695, %v3254_v53  ;;  %v3286_v52 = vmul.f32 1.442695, %v3255_v18 }
 0x315   :  { %v3312_v57 = vsel %vm3191_vm3, %v7311_v56, 0.0  ;;  %v7316_v54 = vpop.eup %6458  ;;  %v1381_v21 = vpop.permute.xlu1 %1380 }
 0x316   :  { %3313 = vadd.xlane.f32.xlu1 %v3312_v57  ;;  %6470 = vpow2.f32 %v3284_v9  ;;  %v3309_v0 = vsel %vm3191_vm3, %v7316_v54, 0.0  ;;  %v1375_v10 = vpop.permute.xlu0 %1374  ;;  %v1550_v36 = vcombine.low %v6726_v25, %v1381_v21  ;;  %v1551_v46 = vcombine.high %v6726_v25, %v1381_v21 }
 0x317   :  { %6472 = vpow2.f32 %v3274_v24 }
 0x318   :  { %v7318_v62 = vpop.eup %6460  ;;  %6474 = vpow2.f32 %v3286_v52  ;;  %v1558_v22 = vrot.slane %v1550_v36, %v6744_v37 }
 0x319   :  { %v3318_v43 = vsel %vm3191_vm3, %v7318_v62, 0.0  ;;  %v7325_v3 = vpop.eup %6462  ;;  %v1387_v27 = vpop.permute.xlu1 %1386 }
 0x31a   :  { %3310 = vadd.xlane.f32.xlu1 %v3309_v0  ;;  %3319 = vadd.xlane.f32.xlu0 %v3318_v43  ;;  %v7327_v40 = vpop.eup %6464  ;;  %v3321_v4 = vsel %vm3191_vm3, %v7325_v3, 0.0  ;;  %v1566_v15 = vcombine.low %v1375_v10, %v1387_v27  ;;  %v1567_v31 = vcombine.high %v1375_v10, %v1387_v27 }
 0x31b   :  { %v3303_v19 = vsel %vm3191_vm3, %v7327_v40, 0.0 }
 0x31c   :  { %v7331_v20 = vpop.eup %6466  ;;  %v1574_v26 = vrot.slane %v1566_v15, %v6744_v37  ;;  %v1581_v63 = vrot.slane %v1567_v31, %v6744_v37 }
 0x31d   :  { %v7335_v2 = vpop.eup %6468  ;;  %v3327_v49 = vsel %vm3191_vm3, %v7331_v20, 0.0  ;;  %v7359_v42 = vpop.permute.xlu1 %1392 }
 0x31e   :  { %3322 = vadd.xlane.f32.xlu1 %v3321_v4  ;;  %3304 = vadd.xlane.f32.xlu0 %v3303_v19  ;;  %v3324_v38 = vsel %vm3191_vm3, %v7335_v2, 0.0  ;;  %v1615_v47 = vcombine.high %v1558_v22, %v1574_v26 }
 0x320   :  { %v7341_v16 = vpop.eup %6470  ;;  %v1629_v55 = vrot.slane %v1615_v47, %v6748_v44 }
 0x321   :  { %v3330_v51 = vsel %vm3191_vm3, %v7341_v16, 0.0  ;;  %v7345_v39 = vpop.eup %6472 }
 0x322   :  { %3328 = vadd.xlane.f32.xlu1 %v3327_v49  ;;  %3325 = vadd.xlane.f32.xlu0 %v3324_v38  ;;  %v3315_v29 = vsel %vm3191_vm3, %v7345_v39, 0.0  ;;  %v7349_v32 = vpop.eup %6474 }
 0x323   :  { %v3333_v5 = vsel %vm3191_vm3, %v7349_v32, 0.0 }
 0x326   :  { %3331 = vadd.xlane.f32.xlu0 %v3330_v51 }
 0x32a   :  { %3316 = vadd.xlane.f32.xlu0 %v3315_v29 }
 0x32e   :  { %3334 = vadd.xlane.f32.xlu0 %v3333_v5 }
 0x333   :  { %1404 = vrot.lane.b32.xlu1 %v6726_v25, %s6561_s23 }
 0x337   :  { %1410 = vrot.lane.b32.xlu1 %v6726_v25, %s6563_s25 }
 0x344   :  { %1398 = vrot.lane.b32.xlu0 %v6726_v25, %s6562_s24  ;;  %v1565_v25 = vrot.slane %v1551_v46, %v6744_v37 }
 0x346   :  { %v1630_v1 = vcombine.low %v1565_v25, %v1581_v63  ;;  %v1631_v9 = vcombine.high %v1565_v25, %v1581_v63 }
 0x348   :  { %v1645_v0 = vrot.slane %v1631_v9, %v6748_v44 }
 0x37e   :  { %v3290_v35 = vpop.xlane.xlu1 %3289 }
 0x37f   :  { %6476 = vrcp.f32 %v3290_v35 }
 0x389   :  { %v6477_v33 = vpop.eup %6476 }
 0x38a   :  { %v7364_v14 = vmul.f32 %v6477_v33, %v7274_v30  ;;  %v1614_v30 = vcombine.low %v1558_v22, %v1574_v26 }
 0x38c   :  { %6227 = vmatmul.mubr.msk.f32.vlgmr.msra.gmra.mrb[12].mxu1 %vm3191_vm3, %v7364_v14  ;;  %v1622_v57 = vrot.slane %v1614_v30, %v6748_v44 }
 0x38d   :  { %6235 = vmatpush3.msra.mxu1 %v1816_v58  ;;  %6236 = vmatprep.mubr.msk.f32.mxu1 %vm6564_vm1, %v6556_v7  ;;  %v1638_v58 = vrot.slane %v1630_v1, %v6748_v44 }
 0x38e   :  { %6244 = vmatprep.subr.mxu1 %v6556_v7  ;;  %v5956_v43 = vcombine.low %v1622_v57, %v1629_v55  ;;  %v5958_v4 = vcombine.high %v1622_v57, %v1629_v55 }
 0x38f   :  { %v3302_v53 = vpop.xlane.xlu1 %3301  ;;  %v5960_v19 = vcombine.low %v1638_v58, %v1645_v0  ;;  %v5962_v49 = vcombine.high %v1638_v58, %v1645_v0 }
 0x390   :  { %v1830_v38 = vrot.slane %v5956_v43, %v6744_v37  ;;  %v1846_v29 = vrot.slane %v5958_v4, %v6744_v37 }
 0x391   :  { %v1862_v5 = vrot.slane %v5960_v19, %v6744_v37  ;;  %v1878_v21 = vrot.slane %v5962_v49, %v6744_v37 }
 0x392   :  { %v1886_v33 = vcombine.low %v1830_v38, %v1846_v29  ;;  %v1887_v25 = vcombine.high %v1830_v38, %v1846_v29 }
 0x393   :  { %v3296_v24 = vpop.xlane.xlu1 %3295  ;;  %v3293_v18 = vpop.xlane.xlu0 %3292  ;;  %v1918_v36 = vcombine.low %v1862_v5, %v1878_v21  ;;  %v1919_v30 = vcombine.high %v1862_v5, %v1878_v21 }
 0x394   :  { %6478 = vrcp.f32 %v3296_v24 }
 0x395   :  { %6480 = vrcp.f32 %v3293_v18  ;;  %v7441_v57 = vrot.slane %v1919_v30, %v6748_v44 }
 0x396   :  { %6482 = vrcp.f32 %v3302_v53 }
 0x397   :  { %v3308_v52 = vpop.xlane.xlu0 %3307 }
 0x398   :  { %6484 = vrcp.f32 %v3308_v52 }
 0x39b   :  { %v3299_v51 = vpop.xlane.xlu0 %3298 }
 0x39c   :  { %6486 = vrcp.f32 %v3299_v51 }
 0x39e   :  { %v6479_v27 = vpop.eup %6478 }
 0x39f   :  { %v6481_v35 = vpop.eup %6480  ;;  %v3354_v10 = vmul.f32 %v6479_v27, %v7287_v59 }
 0x3a0   :  { %v6483_v15 = vpop.eup %6482  ;;  %v3353_v31 = vmul.f32 %v6481_v35, %v7290_v8 }
 0x3a1   :  { %v5255_v46 = vcombine.low %v7364_v14, %v3354_v10  ;;  %v5256_v26 = vcombine.high %v7364_v14, %v3354_v10  ;;  %6237 = vmatmul.mubr.msk.f32.vlgmr.msra.gmra.mrb[14].mxu1 %vm3191_vm3, %v3354_v10  ;;  %v7396_v59 = vmul.f32 %v6483_v15, %v7283_v41  ;;  %v7413_v41 = vrot.slane %v1918_v36, %v6748_v44 }
 0x3a2   :  { %v6485_v63 = vpop.eup %6484  ;;  %6232 = vmatmul.mubr.msk.f32.vlgmr.msra.gmra.mrb[26].mxu0 %vm3191_vm3, %v3353_v31  ;;  %6245 = vmatpush3.msra.mxu1 %v1818_v13  ;;  %v7410_v13 = vrot.slane %v1886_v33, %v6748_v44 }
 0x3a3   :  { %v3314_v22 = vpop.xlane.xlu1 %3313  ;;  %v7399_v8 = vmul.f32 %v6485_v63, %v7297_v17  ;;  %6240 = vmatpush3.msra.mxu0 %v1817_v50  ;;  %6246 = vmatprep.mubr.msk.f32.mxu1 %vm6564_vm1, %v6556_v7  ;;  %v5263_v55 = vrot.slane %v5255_v46, %v6744_v37  ;;  %v5270_v18 = vrot.slane %v5256_v26, %v6744_v37 }
 0x3a4   :  { %6488 = vrcp.f32 %v3314_v22  ;;  %6254 = vmatprep.subr.mxu1 %v6556_v7  ;;  %6241 = vmatprep.mubr.msk.f32.mxu0 %vm6564_vm1, %v6556_v7  ;;  %v1950_v53 = vcombine.low %v7410_v13, %v7413_v41 }
 0x3a5   :  { %v5287_v17 = vcombine.low %v7396_v59, %v7399_v8  ;;  %v5288_v60 = vcombine.high %v7396_v59, %v7399_v8  ;;  %6247 = vmatmul.mubr.msk.f32.vlgmr.msra.gmra.mrb[16].mxu1 %vm3191_vm3, %v7396_v59  ;;  %6249 = vmatprep.subr.mxu0 %v6556_v7 }
 0x3a6   :  { %v6487_v23 = vpop.eup %6486  ;;  %6255 = vmatpush3.msra.mxu1 %v1820_v61  ;;  %6256 = vmatprep.mubr.msk.f32.mxu1 %vm6564_vm1, %v6556_v7 }
 0x3a7   :  { %v3311_v50 = vpop.xlane.xlu1 %3310  ;;  %v3320_v14 = vpop.xlane.xlu0 %3319  ;;  %v3355_v47 = vmul.f32 %v6487_v23, %v7304_v45  ;;  %6264 = vmatprep.subr.mxu1 %v6556_v7  ;;  %v7438_v45 = vrot.slane %v1887_v25, %v6748_v44 }
 0x3a8   :  { %6490 = vrcp.f32 %v3320_v14 }
 0x3a9   :  { %v5271_v1 = vcombine.low %v3353_v31, %v3355_v47  ;;  %v5272_v9 = vcombine.high %v3353_v31, %v3355_v47  ;;  %6492 = vrcp.f32 %v3311_v50  ;;  %6242 = vmatmul.mubr.msk.f32.vlgmr.msra.gmra.mrb[28].mxu0 %vm3191_vm3, %v3355_v47  ;;  %6257 = vmatmul.mubr.msk.f32.vlgmr.msra.gmra.mrb[18].mxu1 %vm3191_vm3, %v7399_v8  ;;  %v1952_v49 = vcombine.low %v7438_v45, %v7441_v57 }
 0x3aa   :  { %6250 = vmatpush3.msra.mxu0 %v1819_v48  ;;  %6265 = vmatpush3.msra.mxu1 %v1950_v53  ;;  %v1953_v25 = vcombine.high %v7438_v45, %v7441_v57 }
 0x3ab   :  { %v3323_v61 = vpop.xlane.xlu1 %3322  ;;  %v3305_v24 = vpop.xlane.xlu0 %3304  ;;  %6266 = vmatprep.mubr.msk.f32.mxu1 %vm6564_vm1, %v6556_v7  ;;  %6274 = vmatprep.subr.mxu1 %v6556_v7  ;;  %v5279_v12 = vrot.slane %v5271_v1, %v6744_v37  ;;  %v5286_v28 = vrot.slane %v5272_v9, %v6744_v37 }
 0x3ac   :  { %6494 = vrcp.f32 %v3305_v24  ;;  %6251 = vmatprep.mubr.msk.f32.mxu0 %vm6564_vm1, %v6556_v7  ;;  %6259 = vmatprep.subr.mxu0 %v6556_v7 }
 0x3ad   :  { %v5319_v58 = vcombine.low %v5263_v55, %v5279_v12  ;;  %v5320_v0 = vcombine.high %v5263_v55, %v5279_v12  ;;  %v5335_v43 = vcombine.low %v5270_v18, %v5286_v28  ;;  %v5336_v52 = vcombine.high %v5270_v18, %v5286_v28 }
 0x3ae   :  { %v6489_v48 = vpop.eup %6488  ;;  %6496 = vrcp.f32 %v3323_v61 }
 0x3af   :  { %v7454_v4 = vmul.f32 %v6489_v48, %v7311_v56  ;;  %v3329_v19 = vpop.xlane.xlu1 %3328  ;;  %v3326_v38 = vpop.xlane.xlu0 %3325  ;;  %v5327_v51 = vrot.slane %v5319_v58, %v6748_v44  ;;  %v5334_v29 = vrot.slane %v5320_v0, %v6748_v44  ;;  %v5343_v5 = vrot.slane %v5335_v43, %v6748_v44 }
 0x3b0   :  { %v5350_v21 = vrot.slane %v5336_v52, %v6748_v44  ;;  %6498 = vrcp.f32 %v3326_v38  ;;  %v5302_v43 = vrot.slane %v5288_v60, %v6744_v37 }
 0x3b1   :  { %6267 = vmatmul.mubr.msk.f32.vlgmr.msra.gmra.mrb[20].mxu1 %vm3191_vm3, %v7454_v4  ;;  %v6029_v56 = vcombine.low %v5327_v51, %v5334_v29  ;;  %v6031_v27 = vcombine.high %v5327_v51, %v5334_v29  ;;  %6500 = vrcp.f32 %v3329_v19 }
 0x3b2   :  { %6275 = vmatpush3.msra.mxu1 %v1952_v49  ;;  %6276 = vmatprep.mubr.msk.f32.mxu1 %vm6564_vm1, %v6556_v7  ;;  %v6491_v35 = vpop.eup %6490  ;;  %v6033_v10 = vcombine.low %v5343_v5, %v5350_v21  ;;  %v6035_v15 = vcombine.high %v5343_v5, %v5350_v21 }
 0x3b3   :  { %6284 = vmatprep.subr.mxu1 %v6556_v7  ;;  %v6493_v31 = vpop.eup %6492  ;;  %v7468_v33 = vmul.f32 %v6491_v35, %v7318_v62  ;;  %v3332_v36 = vpop.xlane.xlu0 %3331  ;;  %v5535_v46 = vrot.slane %v6029_v56, %v6744_v37  ;;  %v5551_v63 = vrot.slane %v6031_v27, %v6744_v37  ;;  %v1951_v62 = vcombine.high %v7410_v13, %v7413_v41 }
 0x3b4   :  { %v1405_v26 = vpop.permute.xlu1 %1404  ;;  %6502 = vrcp.f32 %v3332_v36  ;;  %v5567_v22 = vrot.slane %v6033_v10, %v6744_v37  ;;  %v5583_v23 = vrot.slane %v6035_v15, %v6744_v37  ;;  %v3359_v47 = vmul.f32 %v6493_v31, %v7316_v54 }
 0x3b5   :  { %v5391_v50 = vcombine.low %v7454_v4, %v7468_v33  ;;  %v5392_v14 = vcombine.high %v7454_v4, %v7468_v33  ;;  %6277 = vmatmul.mubr.msk.f32.vlgmr.msra.gmra.mrb[22].mxu1 %vm3191_vm3, %v7468_v33  ;;  %v5592_v53 = vcombine.high %v5535_v46, %v5551_v63  ;;  %v5591_v9 = vcombine.low %v5535_v46, %v5551_v63 }
 0x3b6   :  { %v6495_v30 = vpop.eup %6494  ;;  %6286 = vmatprep.mubr.msk.f32.mxu1 %vm6564_vm1, %v6556_v7  ;;  %v5624_v1 = vcombine.high %v5567_v22, %v5583_v23  ;;  %v1582_v55 = vcombine.low %v7359_v42, %v1405_v26  ;;  %v1583_v24 = vcombine.high %v7359_v42, %v1405_v26  ;;  %v5623_v13 = vcombine.low %v5567_v22, %v5583_v23 }
 0x3b7   :  { %v3357_v61 = vmul.f32 %v6495_v30, %v7327_v40  ;;  %v3317_v18 = vpop.xlane.xlu0 %3316  ;;  %v7491_v41 = vrot.slane %v5592_v53, %v6748_v44  ;;  %v7497_v12 = vrot.slane %v5591_v9, %v6748_v44  ;;  %v5295_v42 = vrot.slane %v5287_v17, %v6744_v37 }
 0x3b8   :  { %6504 = vrcp.f32 %v3317_v18  ;;  %v7494_v54 = vrot.slane %v5624_v1, %v6748_v44  ;;  %v6497_v28 = vpop.eup %6496  ;;  %v7501_v40 = vrot.slane %v5623_v13, %v6748_v44  ;;  %v1590_v17 = vrot.slane %v1582_v55, %v6744_v37  ;;  %v1411_v10 = vpop.permute.xlu1 %1410 }
 0x3b9   :  { %v5303_v48 = vcombine.low %v3357_v61, %v3359_v47  ;;  %v5304_v58 = vcombine.high %v3357_v61, %v3359_v47  ;;  %6252 = vmatmul.mubr.msk.f32.vlgmr.msra.gmra.mrb[30].mxu0 %vm3191_vm3, %v3357_v61  ;;  %v7527_v49 = vmul.f32 %v6497_v28, %v7325_v3  ;;  %v1597_v59 = vrot.slane %v1583_v24, %v6744_v37 }
 0x3ba   :  { %6260 = vmatpush3.msra.mxu0 %v1821_v6  ;;  %6261 = vmatprep.mubr.msk.f32.mxu0 %vm6564_vm1, %v6556_v7  ;;  %v5657_v0 = vcombine.low %v7491_v41, %v7494_v54  ;;  %v5658_v52 = vcombine.high %v7491_v41, %v7494_v54  ;;  %v6499_v4 = vpop.eup %6498  ;;  %v5656_v34 = vcombine.high %v7497_v12, %v7501_v40 }
 0x3bb   :  { %v3335_v19 = vpop.xlane.xlu0 %3334  ;;  %6269 = vmatprep.subr.mxu0 %v6556_v7  ;;  %v5311_v11 = vrot.slane %v5303_v48, %v6744_v37  ;;  %v5318_v6 = vrot.slane %v5304_v58, %v6744_v37  ;;  %v6501_v60 = vpop.eup %6500  ;;  %v7534_v56 = vmul.f32 %v6499_v4, %v7335_v2  ;;  %v7539_v3 = vrot.slane %v5391_v50, %v6744_v37 }
 0x3bc   :  { %6506 = vrcp.f32 %v3335_v19  ;;  %v7542_v27 = vrot.slane %v5392_v14, %v6744_v37  ;;  %v7552_v36 = vmul.f32 %v6501_v60, %v7331_v20 }
 0x3bd   :  { %6262 = vmatmul.mubr.msk.f32.vlgmr.msra.gmra.mrb[32].mxu0 %vm3191_vm3, %v3359_v47  ;;  %v5351_v38 = vcombine.low %v5295_v42, %v5311_v11  ;;  %v5352_v51 = vcombine.high %v5295_v42, %v5311_v11  ;;  %v5367_v29 = vcombine.low %v5302_v43, %v5318_v6  ;;  %v5368_v5 = vcombine.high %v5302_v43, %v5318_v6 }
 0x3be   :  { %v6503_v21 = vpop.eup %6502  ;;  %6270 = vmatpush3.msra.mxu0 %v1951_v62  ;;  %6271 = vmatprep.mubr.msk.f32.mxu0 %vm6564_vm1, %v6556_v7 }
 0x3bf   :  { %v7545_v35 = vmul.f32 %v6503_v21, %v7341_v16  ;;  %v1399_v15 = vpop.permute.xlu0 %1398  ;;  %6279 = vmatprep.subr.mxu0 %v6556_v7  ;;  %v5359_v2 = vrot.slane %v5351_v38, %v6748_v44  ;;  %v5366_v31 = vrot.slane %v5352_v51, %v6748_v44  ;;  %v5375_v33 = vrot.slane %v5367_v29, %v6748_v44 }
 0x3c0   :  { %v1598_v46 = vcombine.low %v1399_v15, %v1411_v10  ;;  %v1599_v26 = vcombine.high %v1399_v15, %v1411_v10  ;;  %v5382_v63 = vrot.slane %v5368_v5, %v6748_v44 }
 0x3c1   :  { %v5423_v16 = vcombine.low %v7534_v56, %v7545_v35  ;;  %v5424_v22 = vcombine.high %v7534_v56, %v7545_v35  ;;  %v6030_v23 = vcombine.low %v5359_v2, %v5366_v31  ;;  %v6032_v50 = vcombine.high %v5359_v2, %v5366_v31 }
 0x3c2   :  { %v6505_v14 = vpop.eup %6504  ;;  %v1606_v62 = vrot.slane %v1598_v46, %v6744_v37  ;;  %v1613_v30 = vrot.slane %v1599_v26, %v6744_v37  ;;  %v6034_v47 = vcombine.low %v5375_v33, %v5382_v63  ;;  %v6036_v20 = vcombine.high %v5375_v33, %v5382_v63 }
 0x3c3   :  { %v3361_v53 = vmul.f32 %v6505_v14, %v7345_v39  ;;  %v5542_v1 = vrot.slane %v6030_v23, %v6744_v37  ;;  %v5558_v9 = vrot.slane %v6032_v50, %v6744_v37  ;;  %v7565_v61 = vrot.slane %v5423_v16, %v6744_v37 }
 0x3c4   :  { %v1646_v55 = vcombine.low %v1590_v17, %v1606_v62  ;;  %v1647_v24 = vcombine.high %v1590_v17, %v1606_v62  ;;  %v1662_v18 = vcombine.low %v1597_v59, %v1613_v30  ;;  %v1663_v13 = vcombine.high %v1597_v59, %v1613_v30 }
 0x3c5   :  { %v5407_v28 = vcombine.low %v3361_v53, %v7527_v49  ;;  %v5408_v48 = vcombine.high %v3361_v53, %v7527_v49  ;;  %6272 = vmatmul.mubr.msk.f32.vlgmr.msra.gmra.mrb[34].mxu0 %vm3191_vm3, %v3361_v53  ;;  %v5574_v58 = vrot.slane %v6034_v47, %v6744_v37  ;;  %v5590_v39 = vrot.slane %v6036_v20, %v6744_v37 }
 0x3c6   :  { %v6507_v42 = vpop.eup %6506  ;;  %v1654_v43 = vrot.slane %v1646_v55, %v6748_v44  ;;  %v1661_v4 = vrot.slane %v1647_v24, %v6748_v44  ;;  %v1670_v19 = vrot.slane %v1662_v18, %v6748_v44  ;;  %v1677_v17 = vrot.slane %v1663_v13, %v6748_v44  ;;  %6280 = vmatpush3.msra.mxu0 %v1953_v25 }
 0x3c7   :  { %v7580_v11 = vmul.f32 %v6507_v42, %v7349_v32  ;;  %6281 = vmatprep.mubr.msk.f32.mxu0 %vm6564_vm1, %v6556_v7  ;;  %6289 = vmatprep.subr.mxu0 %v6556_v7  ;;  %v5607_v6 = vcombine.low %v5542_v1, %v5558_v9  ;;  %v5639_v59 = vcombine.low %v5574_v58, %v5590_v39 }
 0x3c8   :  { %v5957_v60 = vcombine.low %v1654_v43, %v1661_v4  ;;  %v5959_v38 = vcombine.high %v1654_v43, %v1661_v4  ;;  %v5961_v51 = vcombine.low %v1670_v19, %v1677_v17  ;;  %v5963_v29 = vcombine.high %v1670_v19, %v1677_v17 }
 0x3c9   :  { %v5439_v5 = vcombine.low %v7552_v36, %v7580_v11  ;;  %v5440_v45 = vcombine.high %v7552_v36, %v7580_v11  ;;  %6282 = vmatmul.mubr.msk.f32.vlgmr.msra.gmra.mrb[36].mxu0 %vm3191_vm3, %v7527_v49  ;;  %v7592_v32 = vrot.slane %v5607_v6, %v6748_v44  ;;  %v7595_v57 = vrot.slane %v5639_v59, %v6748_v44 }
 0x3ca   :  { %v1837_v25 = vrot.slane %v5957_v60, %v6744_v37  ;;  %v1853_v21 = vrot.slane %v5959_v38, %v6744_v37  ;;  %v1869_v10 = vrot.slane %v5961_v51, %v6744_v37  ;;  %v1885_v15 = vrot.slane %v5963_v29, %v6744_v37  ;;  %6291 = vmatprep.mubr.msk.f32.mxu0 %vm6564_vm1, %v6556_v7 }
 0x3cb   :  { %v5659_v49 = vcombine.low %v7592_v32, %v7595_v57  ;;  %v5608_v2 = vcombine.high %v5542_v1, %v5558_v9  ;;  %v5640_v31 = vcombine.high %v5574_v58, %v5590_v39  ;;  %v5660_v33 = vcombine.high %v7592_v32, %v7595_v57 }
 0x3cc   :  { %v1902_v46 = vcombine.low %v1837_v25, %v1853_v21  ;;  %v1934_v26 = vcombine.low %v1869_v10, %v1885_v15  ;;  %v1903_v63 = vcombine.high %v1837_v25, %v1853_v21  ;;  %v1935_v16 = vcombine.high %v1869_v10, %v1885_v15 }
 0x3cd   :  { %v7608_v23 = vrot.slane %v5608_v2, %v6748_v44  ;;  %v7611_v50 = vrot.slane %v5640_v31, %v6748_v44  ;;  %v5415_v14 = vrot.slane %v5407_v28, %v6744_v37  ;;  %v5422_v62 = vrot.slane %v5408_v48, %v6744_v37 }
 0x3ce   :  { %v1910_v30 = vrot.slane %v1902_v46, %v6748_v44  ;;  %v1942_v47 = vrot.slane %v1934_v26, %v6748_v44  ;;  %v1917_v20 = vrot.slane %v1903_v63, %v6748_v44  ;;  %v1949_v53 = vrot.slane %v1935_v16, %v6748_v44 }
 0x3cf   :  { %v5661_v1 = vcombine.low %v7608_v23, %v7611_v50  ;;  %v5455_v9 = vcombine.low %v7539_v3, %v5415_v14  ;;  %v5456_v55 = vcombine.high %v7539_v3, %v5415_v14  ;;  %v5471_v24 = vcombine.low %v7542_v27, %v5422_v62 }
 0x3d0   :  { %v1954_v18 = vcombine.low %v1910_v30, %v1942_v47  ;;  %v1955_v13 = vcombine.high %v1910_v30, %v1942_v47  ;;  %v1956_v28 = vcombine.low %v1917_v20, %v1949_v53  ;;  %v1957_v48 = vcombine.high %v1917_v20, %v1949_v53 }
 0x3d1   :  { %v5463_v58 = vrot.slane %v5455_v9, %v6748_v44  ;;  %v5470_v39 = vrot.slane %v5456_v55, %v6748_v44  ;;  %v5472_v42 = vcombine.high %v7542_v27, %v5422_v62  ;;  %v5479_v43 = vrot.slane %v5471_v24, %v6748_v44 }
 0x3d2   :  { %6285 = vmatpush3.msra.mxu1 %v1954_v18  ;;  %6290 = vmatpush3.msra.mxu0 %v1955_v13  ;;  %v5662_v4 = vcombine.high %v7608_v23, %v7611_v50  ;;  %v5438_v3 = vrot.slane %v5424_v22, %v6744_v37  ;;  %v5447_v19 = vrot.slane %v5439_v5, %v6744_v37 }
 0x3d3   :  { %6287 = vmatmul.mubr.msk.f32.vlgmr.msra.gmra.mrb[24].mxu1 %vm3191_vm3, %v7534_v56  ;;  %6292 = vmatmul.mubr.msk.f32.vlgmr.msra.gmra.mrb[38].mxu0 %vm3191_vm3, %v7552_v36  ;;  %v5486_v27 = vrot.slane %v5472_v42, %v6748_v44  ;;  %v6037_v17 = vcombine.low %v5463_v58, %v5470_v39  ;;  %v6039_v6 = vcombine.high %v5463_v58, %v5470_v39 }
 0x3d4   :  { %6294 = vmatprep.subr.mxu1 %v6556_v7  ;;  %6299 = vmatprep.subr.mxu0 %v6556_v7  ;;  %v5454_v59 = vrot.slane %v5440_v45, %v6744_v37  ;;  %v5487_v22 = vcombine.low %v7565_v61, %v5447_v19  ;;  %v5488_v60 = vcombine.high %v7565_v61, %v5447_v19 }
 0x3d5   :  { %6295 = vmatpush3.msra.mxu1 %v1956_v28  ;;  %6300 = vmatpush3.msra.mxu0 %v1957_v48  ;;  %v5671_v56 = vrot.slane %v6037_v17, %v6744_v37  ;;  %v5687_v36 = vrot.slane %v6039_v6, %v6744_v37  ;;  %v6041_v38 = vcombine.low %v5479_v43, %v5486_v27 }
 0x3d6   :  { %6296 = vmatprep.mubr.msk.f32.mxu1 %vm6564_vm1, %v6556_v7  ;;  %6301 = vmatprep.mubr.msk.f32.mxu0 %vm6564_vm1, %v6556_v7  ;;  %v6043_v51 = vcombine.high %v5479_v43, %v5486_v27  ;;  %v5495_v29 = vrot.slane %v5487_v22, %v6748_v44  ;;  %v5502_v5 = vrot.slane %v5488_v60, %v6748_v44 }
 0x3d7   :  { %6297 = vmatmul.mubr.msk.f32.vlgmr.msra.gmra.mrb[26].mxu1 %vm3191_vm3, %v7545_v35  ;;  %6302 = vmatmul.mubr.msk.f32.vlgmr.msra.gmra.mrb[40].mxu0 %vm3191_vm3, %v7580_v11  ;;  %v5703_v61 = vrot.slane %v6041_v38, %v6744_v37  ;;  %v5727_v45 = vcombine.low %v5671_v56, %v5687_v36  ;;  %v5728_v25 = vcombine.high %v5671_v56, %v5687_v36  ;;  %v5155_v56 = vld [vmem:[%s8001_s2] sm:$0xff]  ;;  %v5156_v36 = vld [vmem:[%s8001_s2 + $0x8] sm:$0xff]  ;;  %v5157_v38 = vld [vmem:[%s8001_s2 + $0x10] sm:$0xff] }
 0x3d8   :  { %v5719_v21 = vrot.slane %v6043_v51, %v6744_v37  ;;  %v5503_v10 = vcombine.low %v5438_v3, %v5454_v59  ;;  %v5504_v15 = vcombine.high %v5438_v3, %v5454_v59  ;;  %v6038_v7 = vcombine.low %v5495_v29, %v5502_v5 }
 0x3d9   :  { %v7660_v2 = vrot.slane %v5727_v45, %v6748_v44  ;;  %v7663_v31 = vrot.slane %v5728_v25, %v6748_v44  ;;  %v6040_v46 = vcombine.high %v5495_v29, %v5502_v5  ;;  %v6355_v51 = vpack.c.bf16 %v5156_v36, %v5155_v56  ;;  %v5158_v29 = vld [vmem:[%s8001_s2 + $0x18] sm:$0xff]  ;;  %v5160_v45 = vld [vmem:[%s8001_s2 + $0x28] sm:$0xff] }
 0x3da   :  { %v5759_v35 = vcombine.low %v5703_v61, %v5719_v21  ;;  %v5760_v26 = vcombine.high %v5703_v61, %v5719_v21  ;;  %v5511_v11 = vrot.slane %v5503_v10, %v6748_v44  ;;  %v5518_v63 = vrot.slane %v5504_v15, %v6748_v44  ;;  %v5159_v61 = vld [vmem:[%s8001_s2 + $0x20] sm:$0xff] }
 0x3db   :  { %v5678_v16 = vrot.slane %v6038_v7, %v6744_v37  ;;  %v5694_v14 = vrot.slane %v6040_v46, %v6744_v37  ;;  %v6359_v5 = vpack.c.bf16 %v5158_v29, %v5157_v38  ;;  %6356 = vmatprep.subr.bf16.mxu1 %v6355_v51  ;;  %v6363_v25 = vpack.c.bf16 %v5160_v45, %v5159_v61 }
 0x3dc   :  { %v7670_v62 = vrot.slane %v5759_v35, %v6748_v44  ;;  %v7673_v30 = vrot.slane %v5760_v26, %v6748_v44  ;;  %v6042_v47 = vcombine.low %v5511_v11, %v5518_v63  ;;  %v6044_v20 = vcombine.high %v5511_v11, %v5518_v63  ;;  %6358 = vmatpush3.bf16.msra.mxu1 %v6355_v51 }
 0x3dd   :  { %v5743_v53 = vcombine.low %v5678_v16, %v5694_v14  ;;  %v5744_v9 = vcombine.high %v5678_v16, %v5694_v14  ;;  %6360 = vmatprep.subr.bf16.mxu1 %v6359_v5 }
 0x3de   :  { %v5791_v55 = vcombine.low %v7660_v2, %v7670_v62  ;;  %v5710_v13 = vrot.slane %v6042_v47, %v6744_v37  ;;  %v5726_v28 = vrot.slane %v6044_v20, %v6744_v37  ;;  %v8005_v41 = vcombine.low %v7663_v31, %v7673_v30 }
 0x3df   :  { %v7686_v58 = vrot.slane %v5743_v53, %v6748_v44  ;;  %v7689_v42 = vrot.slane %v5744_v9, %v6748_v44  ;;  %v8006_v54 = vcombine.high %v7660_v2, %v7670_v62 }
 0x3e0   :  { %v5775_v39 = vcombine.low %v5710_v13, %v5726_v28  ;;  %v5776_v43 = vcombine.high %v5710_v13, %v5726_v28  ;;  %6362 = vmatpush3.bf16.msra.mxu1 %v6359_v5 }
 0x3e1   :  { %6364 = vmatprep.subr.bf16.mxu1 %v6363_v25 }
 0x3e2   :  { %v7692_v3 = vrot.slane %v5775_v39, %v6748_v44  ;;  %v7695_v19 = vrot.slane %v5776_v43, %v6748_v44 }
 0x3e4   :  { %6366 = vmatpush3.bf16.msra.mxu1 %v6363_v25  ;;  %v8010_v32 = vcombine.high %v7686_v58, %v7692_v3  ;;  %v8011_v57 = vcombine.high %v7689_v42, %v7695_v19 }
 0x45f   :  { %v3437_v22 = vpop.f32.mrb[12].mxu1 }
 0x460   :  { %v6228_v60 = vpop.f32.mrb[13].mxu1 }
 0x474   :  { %v3583_v21 = vpop.f32.mrb[14].mxu1 }
 0x475   :  { %v3510_v10 = vpop.f32.mrb[26].mxu0  ;;  %v4536_v15 = vcombine.low %v3437_v22, %v3583_v21  ;;  %v4537_v7 = vcombine.high %v3437_v22, %v3583_v21  ;;  %v6238_v46 = vpop.f32.mrb[15].mxu1 }
 0x476   :  { %v6233_v35 = vpop.f32.mrb[27].mxu0 }
 0x477   :  { %v4544_v28 = vrot.slane %v4536_v15, %v6744_v37  ;;  %v4551_v39 = vrot.slane %v4537_v7, %v6744_v37 }
 0x478   :  { %v3729_v26 = vpop.f32.mrb[16].mxu1 }
 0x479   :  { %v6248_v11 = vpop.f32.mrb[17].mxu1 }
 0x47c   :  { %v3656_v63 = vpop.f32.mrb[28].mxu0  ;;  %v3875_v16 = vpop.f32.mrb[18].mxu1 }
 0x47d   :  { %v4552_v14 = vcombine.low %v3510_v10, %v3656_v63  ;;  %v4553_v47 = vcombine.high %v3510_v10, %v3656_v63  ;;  %v4568_v20 = vcombine.low %v3729_v26, %v3875_v16  ;;  %v4569_v53 = vcombine.high %v3729_v26, %v3875_v16  ;;  %v6243_v9 = vpop.f32.mrb[29].mxu0  ;;  %v6258_v13 = vpop.f32.mrb[19].mxu1 }
 0x47f   :  { %v4560_v43 = vrot.slane %v4552_v14, %v6744_v37  ;;  %v4567_v22 = vrot.slane %v4553_v47, %v6744_v37 }
 0x481   :  { %v4600_v60 = vcombine.low %v4544_v28, %v4560_v43  ;;  %v4601_v56 = vcombine.high %v4544_v28, %v4560_v43  ;;  %v4616_v36 = vcombine.low %v4551_v39, %v4567_v22  ;;  %v4617_v38 = vcombine.high %v4551_v39, %v4567_v22 }
 0x483   :  { %v4608_v51 = vrot.slane %v4600_v60, %v6748_v44  ;;  %v4615_v29 = vrot.slane %v4601_v56, %v6748_v44  ;;  %v4624_v5 = vrot.slane %v4616_v36, %v6748_v44  ;;  %v4631_v61 = vrot.slane %v4617_v38, %v6748_v44 }
 0x484   :  { %v4021_v45 = vpop.f32.mrb[20].mxu1 }
 0x485   :  { %v6268_v25 = vpop.f32.mrb[21].mxu1  ;;  %v6012_v21 = vcombine.low %v4608_v51, %v4615_v29  ;;  %v6014_v10 = vcombine.high %v4608_v51, %v4615_v29  ;;  %v6016_v15 = vcombine.low %v4624_v5, %v4631_v61  ;;  %v6018_v7 = vcombine.high %v4624_v5, %v4631_v61 }
 0x487   :  { %v4816_v46 = vrot.slane %v6012_v21, %v6744_v37  ;;  %v4832_v35 = vrot.slane %v6014_v10, %v6744_v37  ;;  %v4848_v26 = vrot.slane %v6016_v15, %v6744_v37  ;;  %v4864_v11 = vrot.slane %v6018_v7, %v6744_v37 }
 0x488   :  { %v4167_v63 = vpop.f32.mrb[22].mxu1  ;;  %v4576_v15 = vrot.slane %v4568_v20, %v6744_v37  ;;  %v4583_v7 = vrot.slane %v4569_v53, %v6744_v37 }
 0x489   :  { %v4672_v16 = vcombine.low %v4021_v45, %v4167_v63  ;;  %v4673_v14 = vcombine.high %v4021_v45, %v4167_v63  ;;  %v6278_v47 = vpop.f32.mrb[23].mxu1  ;;  %v4873_v9 = vcombine.high %v4816_v46, %v4832_v35  ;;  %v4905_v13 = vcombine.high %v4848_v26, %v4864_v11 }
 0x48a   :  { %v4872_v28 = vcombine.low %v4816_v46, %v4832_v35  ;;  %v4904_v39 = vcombine.low %v4848_v26, %v4864_v11 }
 0x48b   :  { %v7736_v43 = vrot.slane %v4873_v9, %v6748_v44  ;;  %v7739_v22 = vrot.slane %v4905_v13, %v6748_v44  ;;  %v4680_v8 = vrot.slane %v4672_v16, %v6744_v37 }
 0x48c   :  { %v3802_v60 = vpop.f32.mrb[30].mxu0  ;;  %v7742_v56 = vrot.slane %v4872_v28, %v6748_v44  ;;  %v7745_v36 = vrot.slane %v4904_v39, %v6748_v44 }
 0x48d   :  { %v6253_v38 = vpop.f32.mrb[31].mxu0  ;;  %v4938_v51 = vcombine.low %v7736_v43, %v7739_v22  ;;  %v4939_v29 = vcombine.high %v7736_v43, %v7739_v22  ;;  %v5167_v43 = vld [vmem:[%s8001_s2 + $0x60] sm:$0xff]  ;;  %v5168_v22 = vld [vmem:[%s8001_s2 + $0x68] sm:$0xff] }
 0x48e   :  { %v4937_v61 = vcombine.high %v7742_v56, %v7745_v36 }
 0x490   :  { %v3948_v45 = vpop.f32.mrb[32].mxu0 }
 0x491   :  { %v4584_v25 = vcombine.low %v3802_v60, %v3948_v45  ;;  %v4585_v21 = vcombine.high %v3802_v60, %v3948_v45  ;;  %v6263_v10 = vpop.f32.mrb[33].mxu0 }
 0x493   :  { %v4592_v46 = vrot.slane %v4584_v25, %v6744_v37  ;;  %v4599_v35 = vrot.slane %v4585_v21, %v6744_v37 }
 0x495   :  { %v4632_v26 = vcombine.low %v4576_v15, %v4592_v46  ;;  %v4633_v11 = vcombine.high %v4576_v15, %v4592_v46  ;;  %v4648_v63 = vcombine.low %v4583_v7, %v4599_v35  ;;  %v4649_v47 = vcombine.high %v4583_v7, %v4599_v35 }
 0x497   :  { %v4640_v9 = vrot.slane %v4632_v26, %v6748_v44  ;;  %v4647_v13 = vrot.slane %v4633_v11, %v6748_v44  ;;  %v4656_v28 = vrot.slane %v4648_v63, %v6748_v44  ;;  %v4663_v39 = vrot.slane %v4649_v47, %v6748_v44 }
 0x498   :  { %v4094_v60 = vpop.f32.mrb[34].mxu0 }
 0x499   :  { %v6013_v20 = vcombine.low %v4640_v9, %v4647_v13  ;;  %v6015_v38 = vcombine.high %v4640_v9, %v4647_v13  ;;  %v6017_v53 = vcombine.low %v4656_v28, %v4663_v39  ;;  %v6019_v45 = vcombine.high %v4656_v28, %v4663_v39  ;;  %v6273_v25 = vpop.f32.mrb[35].mxu0 }
 0x49a   :  { %v4687_v9 = vrot.slane %v4673_v14, %v6744_v37 }
 0x49b   :  { %v4823_v21 = vrot.slane %v6013_v20, %v6744_v37  ;;  %v4839_v10 = vrot.slane %v6015_v38, %v6744_v37  ;;  %v4855_v15 = vrot.slane %v6017_v53, %v6744_v37  ;;  %v4871_v7 = vrot.slane %v6019_v45, %v6744_v37 }
 0x49c   :  { %v4240_v46 = vpop.f32.mrb[36].mxu0 }
 0x49d   :  { %v4688_v35 = vcombine.low %v4094_v60, %v4240_v46  ;;  %v4689_v26 = vcombine.high %v4094_v60, %v4240_v46  ;;  %v6283_v11 = vpop.f32.mrb[37].mxu0  ;;  %v4888_v63 = vcombine.low %v4823_v21, %v4839_v10  ;;  %v4920_v47 = vcombine.low %v4855_v15, %v4871_v7 }
 0x49e   :  { %v4889_v13 = vcombine.high %v4823_v21, %v4839_v10  ;;  %v4921_v28 = vcombine.high %v4855_v15, %v4871_v7 }
 0x49f   :  { %v4696_v39 = vrot.slane %v4688_v35, %v6744_v37  ;;  %v4703_v20 = vrot.slane %v4689_v26, %v6744_v37  ;;  %v7772_v38 = vrot.slane %v4888_v63, %v6748_v44  ;;  %v7775_v53 = vrot.slane %v4920_v47, %v6748_v44 }
 0x4a0   :  { %v7778_v60 = vrot.slane %v4889_v13, %v6748_v44  ;;  %v7781_v45 = vrot.slane %v4921_v28, %v6748_v44 }
 0x4a1   :  { %v4736_v16 = vcombine.low %v4680_v8, %v4696_v39  ;;  %v4737_v14 = vcombine.high %v4680_v8, %v4696_v39  ;;  %v4752_v25 = vcombine.low %v4687_v9, %v4703_v20  ;;  %v4753_v21 = vcombine.high %v4687_v9, %v4703_v20 }
 0x4a2   :  { %v4941_v10 = vcombine.high %v7772_v38, %v7775_v53  ;;  %v4940_v15 = vcombine.low %v7772_v38, %v7775_v53  ;;  %v4943_v7 = vcombine.high %v7778_v60, %v7781_v45  ;;  %v4942_v46 = vcombine.low %v7778_v60, %v7781_v45 }
 0x4a3   :  { %v4744_v35 = vrot.slane %v4736_v16, %v6748_v44  ;;  %v4751_v26 = vrot.slane %v4737_v14, %v6748_v44  ;;  %v4760_v8 = vrot.slane %v4752_v25, %v6748_v44  ;;  %v4767_v11 = vrot.slane %v4753_v21, %v6748_v44  ;;  %v5161_v25 = vld [vmem:[%s8001_s2 + $0x30] sm:$0xff]  ;;  %v5162_v21 = vld [vmem:[%s8001_s2 + $0x38] sm:$0xff] }
 0x4a5   :  { %v6020_v63 = vcombine.low %v4744_v35, %v4751_v26  ;;  %v6022_v47 = vcombine.high %v4744_v35, %v4751_v26  ;;  %v6024_v9 = vcombine.low %v4760_v8, %v4767_v11  ;;  %v6026_v13 = vcombine.high %v4760_v8, %v4767_v11 }
 0x4a6   :  { %v4313_v28 = vpop.f32.mrb[24].mxu1  ;;  %v4386_v39 = vpop.f32.mrb[38].mxu0  ;;  %v6367_v35 = vpack.c.bf16 %v5162_v21, %v5161_v25 }
 0x4a7   :  { %v4952_v20 = vrot.slane %v6020_v63, %v6744_v37  ;;  %v4968_v5 = vrot.slane %v6022_v47, %v6744_v37  ;;  %v4984_v59 = vrot.slane %v6024_v9, %v6744_v37  ;;  %v5000_v16 = vrot.slane %v6026_v13, %v6744_v37  ;;  %v6288_v6 = vpop.f32.mrb[25].mxu1  ;;  %v6293_v14 = vpop.f32.mrb[39].mxu0 }
 0x4a8   :  { %6368 = vmatprep.subr.bf16.mxu1 %v6367_v35 }
 0x4a9   :  { %v5009_v26 = vcombine.high %v4952_v20, %v4968_v5  ;;  %v5041_v8 = vcombine.high %v4984_v59, %v5000_v16  ;;  %v5008_v11 = vcombine.low %v4952_v20, %v4968_v5  ;;  %v5040_v63 = vcombine.low %v4984_v59, %v5000_v16  ;;  %6370 = vmatpush3.bf16.msra.mxu1 %v6367_v35 }
 0x4aa   :  { %v4459_v47 = vpop.f32.mrb[26].mxu1  ;;  %v4532_v17 = vpop.f32.mrb[40].mxu0 }
 0x4ab   :  { %v4704_v9 = vcombine.low %v4313_v28, %v4459_v47  ;;  %v4705_v13 = vcombine.high %v4313_v28, %v4459_v47  ;;  %v4720_v6 = vcombine.low %v4386_v39, %v4532_v17  ;;  %v4721_v14 = vcombine.high %v4386_v39, %v4532_v17  ;;  %v6298_v48 = vpop.f32.mrb[27].mxu1  ;;  %v6303_v27 = vpop.f32.mrb[41].mxu0  ;;  %v5164_v17 = vld [vmem:[%s8001_s2 + $0x48] sm:$0xff]  ;;  %v5165_v47 = vld [vmem:[%s8001_s2 + $0x50] sm:$0xff] }
 0x4ac   :  { %v5023_v18 = vrot.slane %v5009_v26, %v6748_v44  ;;  %v5055_v24 = vrot.slane %v5041_v8, %v6748_v44  ;;  %v7808_v25 = vrot.slane %v5008_v11, %v6748_v44  ;;  %v7811_v5 = vrot.slane %v5040_v63, %v6748_v44  ;;  %v5163_v27 = vld [vmem:[%s8001_s2 + $0x40] sm:$0xff] }
 0x4ad   :  { %v4712_v59 = vrot.slane %v4704_v9, %v6744_v37  ;;  %v4719_v20 = vrot.slane %v4705_v13, %v6744_v37  ;;  %v4728_v28 = vrot.slane %v4720_v6, %v6744_v37  ;;  %v4735_v48 = vrot.slane %v4721_v14, %v6744_v37  ;;  %v5166_v9 = vld [vmem:[%s8001_s2 + $0x58] sm:$0xff] }
 0x4ae   :  { %v5074_v39 = vcombine.low %v5023_v18, %v5055_v24  ;;  %v5073_v16 = vcombine.high %v7808_v25, %v7811_v5  ;;  %v5072_v21 = vcombine.low %v7808_v25, %v7811_v5  ;;  %v5075_v35 = vcombine.high %v5023_v18, %v5055_v24 }
 0x4af   :  { %v4768_v26 = vcombine.low %v4712_v59, %v4728_v28  ;;  %v4769_v8 = vcombine.high %v4712_v59, %v4728_v28  ;;  %v4784_v11 = vcombine.low %v4719_v20, %v4735_v48  ;;  %v4785_v63 = vcombine.high %v4719_v20, %v4735_v48 }
 0x4b0   :  { %v6414_v13 = vpack.i.bf16 %v5074_v39, %v4938_v51  ;;  %v6409_v24 = vpack.i.bf16 %v5073_v16, %v4937_v61  ;;  %v6419_v18 = vpack.i.bf16 %v5075_v35, %v4939_v29  ;;  %v6371_v6 = vpack.c.bf16 %v5164_v17, %v5163_v27 }
 0x4b1   :  { %v4776_v14 = vrot.slane %v4768_v26, %v6748_v44  ;;  %v4783_v59 = vrot.slane %v4769_v8, %v6748_v44  ;;  %v4792_v20 = vrot.slane %v4784_v11, %v6748_v44  ;;  %v4799_v28 = vrot.slane %v4785_v63, %v6748_v44  ;;  %v5169_v8 = vld [vmem:[%s8001_s2 + $0x70] sm:$0xff]  ;;  %v5170_v11 = vld [vmem:[%s8001_s2 + $0x78] sm:$0xff]  ;;  %s6567_s2 = smov 8  }
 0x4b2   :  { %6415 = vrot.lane.b32.xlu1 %v6414_v13, %s6561_s23  ;;  %6410 = vrot.lane.b32.xlu0 %v6409_v24, %s6563_s25  ;;  %v6375_v51 = vpack.c.bf16 %v5166_v9, %v5165_v47  ;;  %v6379_v26 = vpack.c.bf16 %v5168_v22, %v5167_v43  ;;  %v6383_v24 = vpack.c.bf16 %v5170_v11, %v5169_v8 }
 0x4b3   :  { %v6021_v48 = vcombine.low %v4776_v14, %v4783_v59  ;;  %v6023_v61 = vcombine.high %v4776_v14, %v4783_v59  ;;  %v6025_v39 = vcombine.low %v4792_v20, %v4799_v28  ;;  %v6027_v16 = vcombine.high %v4792_v20, %v4799_v28  ;;  %6372 = vmatprep.subr.bf16.mxu1 %v6371_v6 }
 0x4b4   :  { %6374 = vmatpush3.bf16.msra.mxu1 %v6371_v6 }
 0x4b5   :  { %v4959_v29 = vrot.slane %v6021_v48, %v6744_v37  ;;  %v4975_v27 = vrot.slane %v6023_v61, %v6744_v37  ;;  %v4991_v17 = vrot.slane %v6025_v39, %v6744_v37  ;;  %v5007_v35 = vrot.slane %v6027_v16, %v6744_v37  ;;  %6376 = vmatprep.subr.bf16.mxu1 %v6375_v51 }
 0x4b6   :  { %6420 = vrot.lane.b32.xlu0 %v6419_v18, %s6562_s24 }
 0x4b7   :  { %v5024_v63 = vcombine.low %v4959_v29, %v4975_v27  ;;  %v5056_v47 = vcombine.low %v4991_v17, %v5007_v35  ;;  %v5025_v9 = vcombine.high %v4959_v29, %v4975_v27  ;;  %v5057_v13 = vcombine.high %v4991_v17, %v5007_v35 }
 0x4b8   :  { %6378 = vmatpush3.bf16.msra.mxu1 %v6375_v51 }
 0x4b9   :  { %v5032_v37 = vrot.slane %v5024_v63, %v6748_v44  ;;  %v5064_v6 = vrot.slane %v5056_v47, %v6748_v44  ;;  %v5039_v18 = vrot.slane %v5025_v9, %v6748_v44  ;;  %v5071_v14 = vrot.slane %v5057_v13, %v6748_v44  ;;  %6380 = vmatprep.subr.bf16.mxu1 %v6379_v26 }
 0x4ba   :  { %v8013_v63 = vcombine.low %v7497_v12, %v7501_v40 }
 0x4bb   :  { %v5077_v59 = vcombine.high %v5032_v37, %v5064_v6  ;;  %v5076_v20 = vcombine.low %v5032_v37, %v5064_v6  ;;  %v5079_v28 = vcombine.high %v5039_v18, %v5071_v14  ;;  %v5078_v48 = vcombine.low %v5039_v18, %v5071_v14 }
 0x4bc   :  { %6382 = vmatpush3.bf16.msra.mxu1 %v6379_v26 }
 0x4bd   :  { %v6429_v61 = vpack.i.bf16 %v5077_v59, %v4941_v10  ;;  %v6424_v51 = vpack.i.bf16 %v5076_v20, %v4940_v15  ;;  %v6439_v39 = vpack.i.bf16 %v5079_v28, %v4943_v7  ;;  %v6434_v44 = vpack.i.bf16 %v5078_v48, %v4942_v46  ;;  %6384 = vmatprep.subr.bf16.mxu1 %v6383_v24 }
 0x4bf   :  { %6430 = vrot.lane.b32.xlu0 %v6429_v61, %s6560_s22  ;;  %6425 = vrot.lane.b32.xlu1 %v6424_v51, %s6559_s0 }
 0x4c0   :  { %6386 = vmatpush3.bf16.msra.mxu1 %v6383_v24 }
 0x4c3   :  { %6440 = vrot.lane.b32.xlu0 %v6439_v39, %s6558_s21  ;;  %6435 = vrot.lane.b32.xlu1 %v6434_v44, %s6557_s1 }
 0x4c7   :  { %5804 = vrot.lane.b32.xlu0 %v5657_v0, %s6563_s25  ;;  %5800 = vrot.lane.b32.xlu1 %v5656_v34, %s6567_s2  ;;  %s6569_s25 = smov 40   ;;  %v8007_v0 = vcombine.low %v7686_v58, %v7692_v3  ;;  %v8009_v34 = vcombine.low %v7689_v42, %v7695_v19 }
 0x4cb   :  { %5812 = vrot.lane.b32.xlu0 %v5659_v49, %s6561_s23  ;;  %5808 = vrot.lane.b32.xlu1 %v5658_v52, %s6568_s13  ;;  %s6570_s23 = smov 56   ;;  %v8008_v52 = vcombine.high %v7663_v31, %v7673_v30  ;;  %v8012_v31 = vcombine.low %v7742_v56, %v7745_v36 }
 0x4cf   :  { %5820 = vrot.lane.b32.xlu0 %v5661_v1, %s6562_s24  ;;  %5816 = vrot.lane.b32.xlu1 %v5660_v33, %s6569_s25  ;;  %s6571_s24 = smov 72  }
 0x4d3   :  { %5828 = vrot.lane.b32.xlu0 %v5791_v55, %s6559_s0  ;;  %5824 = vrot.lane.b32.xlu1 %v5662_v4, %s6570_s23  ;;  %s6572_s0 = smov 88  }
 0x4d7   :  { %5836 = vrot.lane.b32.xlu0 %v8005_v41, %s6560_s22  ;;  %5832 = vrot.lane.b32.xlu1 %v8006_v54, %s6571_s24  ;;  %s6573_s22 = smov 104  }
 0x4db   :  { %5844 = vrot.lane.b32.xlu0 %v8007_v0, %s6557_s1  ;;  %5840 = vrot.lane.b32.xlu1 %v8008_v52, %s6572_s0  ;;  %s6575_s1 = smov [#allocation4]  }
 0x4df   :  { %5852 = vrot.lane.b32.xlu0 %v8009_v34, %s6558_s21  ;;  %5848 = vrot.lane.b32.xlu1 %v8010_v32, %s6573_s22  ;;  %s5900_s21 = sshll.u32 %s6575_s1, 4  ;;  %s5901_s21 = int_to_ptr.vmem [resolvable:$true] %s5900_s21 }
 0x4e0   :  { %s6508_s15 = scalar_lea.vmem %s5901_s21, 128  ;;  %p6513_p1 = scmp.lt.s32.totalorder %s5901_s21, %s5901_s21 }
 0x4e1   :  { %p6509_p0 = scmp.ne.s32.totalorder %s5901_s21, %s6508_s15  ;;  %p6514_p2 = scmp.lt.s32.totalorder %s6508_s15, %s6508_s15 }
 0x4e3   :  { %5856 = vrot.lane.b32.xlu1 %v8011_v57, %s6574_s14  ;;  %p6515_p3 = por %p6514_p2, %p6513_p1 }
 0x4e5   :  { %p6516_p4 = pnand %p6515_p3, %p6509_p0 }
 0x524   :  { %v6411_v49 = vpop.permute.xlu0 %6410  ;;  %v6416_v33 = vpop.permute.xlu1 %6415 }
 0x525   :  { %v6413_v23 = vunpack.i.h.bf16 %v6411_v49  ;;  %v6412_v50 = vunpack.i.l.bf16 %v6411_v49  ;;  %v6418_v4 = vunpack.i.h.bf16 %v6416_v33  ;;  %v6417_v2 = vunpack.i.l.bf16 %v6416_v33 }
 0x527   :  { %v5136_v62 = vsel %vm1958_vm2, %v8012_v31, %v6412_v50  ;;  %v5137_v30 = vsel %vm1958_vm2, %v5072_v21, %v6413_v23 }
 0x528   :  { %v6421_v1 = vpop.permute.xlu0 %6420  ;;  %v5138_v19 = vsel %vm35_vm0, %v5136_v62, %v6417_v2  ;;  %v5139_v38 = vsel %vm35_vm0, %v5137_v30, %v6418_v4 }
 0x529   :  { %v6423_v55 = vunpack.i.h.bf16 %v6421_v1  ;;  %v6422_v58 = vunpack.i.l.bf16 %v6421_v1 }
 0x52b   :  { %v5141_v56 = vsel %vm5140_vm4, %v5138_v19, %v6422_v58  ;;  %v5142_v36 = vsel %vm5140_vm4, %v5139_v38, %v6423_v55 }
 0x531   :  { %v6431_v42 = vpop.permute.xlu0 %6430  ;;  %v6426_v3 = vpop.permute.xlu1 %6425 }
 0x532   :  { %v6428_v53 = vunpack.i.h.bf16 %v6426_v3  ;;  %v6427_v60 = vunpack.i.l.bf16 %v6426_v3  ;;  %v6433_v45 = vunpack.i.h.bf16 %v6431_v42  ;;  %v6432_v10 = vunpack.i.l.bf16 %v6431_v42 }
 0x534   :  { %v5145_v15 = vsel %vm5143_vm5, %v5142_v36, %v6428_v53  ;;  %v5144_v7 = vsel %vm5143_vm5, %v5141_v56, %v6427_v60 }
 0x535   :  { %v6441_v46 = vpop.permute.xlu0 %6440  ;;  %v6436_v25 = vpop.permute.xlu1 %6435  ;;  %v5147_v22 = vsel %vm5146_vm6, %v5144_v7, %v6432_v10  ;;  %v5148_v29 = vsel %vm5146_vm6, %v5145_v15, %v6433_v45 }
 0x536   :  { %v6443_v5 = vunpack.i.h.bf16 %v6441_v46  ;;  %v6442_v21 = vunpack.i.l.bf16 %v6441_v46  ;;  %v6438_v16 = vunpack.i.h.bf16 %v6436_v25  ;;  %v6437_v43 = vunpack.i.l.bf16 %v6436_v25 }
 0x538   :  { %v5150_v27 = vsel %vm5149_vm7, %v5147_v22, %v6437_v43  ;;  %v5151_v17 = vsel %vm5149_vm7, %v5148_v29, %v6438_v16 }
 0x539   :  { %v5805_v35 = vpop.permute.xlu0 %5804  ;;  %v5801_v26 = vpop.permute.xlu1 %5800  ;;  %v5153_v8 = vsel %vm5152_vm8, %v5150_v27, %v6442_v21  ;;  %v5154_v11 = vsel %vm5152_vm8, %v5151_v17, %v6443_v5 }
 0x53a   :  { %v5859_v47 = vsel %vm3191_vm3, %v8013_v63, %v5801_v26  ;;  %6336 = vmatprep.mubr.f32.mxu1 %v5153_v8 }
 0x53b   :  { %6337 = vmatmul.mubr.f32.vlgmr.msra.gmra.mrb[28].mxu1 %v5154_v11  ;;  %v5860_v13 = vsel %vm1958_vm2, %v5859_v47, %v5805_v35 }
 0x53d   :  { %v5813_v9 = vpop.permute.xlu0 %5812  ;;  %v5809_v24 = vpop.permute.xlu1 %5808 }
 0x53e   :  { %v5862_v37 = vsel %vm5861_vm9, %v5860_v13, %v5809_v24 }
 0x53f   :  { %v5863_v18 = vsel %vm35_vm0, %v5862_v37, %v5813_v9 }
 0x541   :  { %v5821_v6 = vpop.permute.xlu0 %5820  ;;  %v5817_v14 = vpop.permute.xlu1 %5816 }
 0x542   :  { %v5865_v59 = vsel %vm5864_vm10, %v5863_v18, %v5817_v14 }
 0x543   :  { %v5866_v12 = vsel %vm5140_vm4, %v5865_v59, %v5821_v6 }
 0x545   :  { %v5829_v20 = vpop.permute.xlu0 %5828  ;;  %v5825_v40 = vpop.permute.xlu1 %5824 }
 0x546   :  { %v5868_v28 = vsel %vm5867_vm11, %v5866_v12, %v5825_v40 }
 0x547   :  { %v5869_v61 = vsel %vm5143_vm5, %v5868_v28, %v5829_v20 }
 0x549   :  { %v5837_v48 = vpop.permute.xlu0 %5836  ;;  %v5833_v51 = vpop.permute.xlu1 %5832 }
 0x54a   :  { %v5871_v39 = vsel %vm5870_vm12, %v5869_v61, %v5833_v51 }
 0x54b   :  { %v5872_v41 = vsel %vm5146_vm6, %v5871_v39, %v5837_v48 }
 0x54d   :  { %v5845_v44 = vpop.permute.xlu0 %5844  ;;  %v5841_v54 = vpop.permute.xlu1 %5840 }
 0x54e   :  { %v5874_v0 = vsel %vm5873_vm13, %v5872_v41, %v5841_v54 }
 0x54f   :  { %v5875_v52 = vsel %vm5149_vm7, %v5874_v0, %v5845_v44 }
 0x551   :  { %v5849_v34 = vpop.permute.xlu1 %5848  ;;  %v5853_v32 = vpop.permute.xlu0 %5852 }
 0x552   :  { %v5877_v57 = vsel %vm5876_vm14, %v5875_v52, %v5849_v34 }
 0x553   :  { %v5878_v49 = vsel %vm5152_vm8, %v5877_v57, %v5853_v32 }
 0x555   :  { %v5857_v33 = vpop.permute.xlu1 %5856 }
 0x556   :  { %v5880_v23 = vsel %vm5879_vm15, %v5878_v49, %v5857_v33 }
 0x557   :  { %5881 = vst [vmem:[#allocation4] sm:$0xff] %v5880_v23 }
 0x558   :  { %6519 = shalt.err (!%p6516_p4)
}
 0x559   :  { %s6520_s18 = scalar_lea.hbm %s8004_s5, 128 }
 0x55a   :  { %p6521_p5 = scmp.ne.s32.totalorder %s8004_s5, %s6520_s18  ;;  %p6524_p6 = scmp.lt.u32.totalorder %s6520_s18, %s8004_s5 }
 0x55c   :  { %p6526_p7 = pnand %p6524_p6, %p6521_p5 }
 0x55e   :  { %6529 = shalt.err (!%p6526_p7)
}
 0x55f   :  { %5903 = dma.vmem_to_hbm [thread:$0]  %s5901_s21, 128, %s8004_s5, [#allocation5]   ;;  %v6028_v50 = vld [vmem:[%s8002_s3] ss:$0 sm:$0xff] }
 0x560   :  { %s6576_s7 = smov [#allocation2]  }
 0x561   :  { %s5887_s8 = sshll.u32 %s6576_s7, 4  ;;  %s5888_s8 = int_to_ptr.vmem [resolvable:$true] %s5887_s8 }
 0x562   :  { %s6530_s9 = scalar_lea.vmem %s5888_s8, 256  ;;  %p6535_p9 = scmp.lt.s32.totalorder %s5888_s8, %s5888_s8 }
 0x563   :  { %p6531_p8 = scmp.ne.s32.totalorder %s5888_s8, %s6530_s9  ;;  %p6536_p10 = scmp.lt.s32.totalorder %s6530_s9, %s6530_s9 }
 0x565   :  { %p6537_p11 = por %p6536_p10, %p6535_p9 }
 0x567   :  { %p6538_p12 = pnand %p6537_p11, %p6531_p8 }
 0x60e   :  { %v6338_v1 = vpop.f32.mrb[28].mxu1 }
 0x60f   :  { %v5250_v4 = vadd.f32 %v6338_v1, %v6028_v50  ;;  %v5244_v2 = vpop.f32.mrb[29].mxu1 }
 0x610   :  { %v5245_v31 = vadd.f32 %v6028_v50, %v5244_v2 }
 0x611   :  { %5254 = vst.msk [vmem:[#allocation2 + $0x8] sm:$0xff] %vm35_vm0, %v5250_v4 }
 0x612   :  { %5253 = vst.msk [vmem:[#allocation2] sm:$0xff] %vm35_vm0, %v5245_v31 }
 0x613   :  { %6541 = shalt.err (!%p6538_p12)
}
 0x614   :  { %s6542_s10 = scalar_lea.hbm %s8003_s4, 256 }
 0x615   :  { %p6543_p13 = scmp.ne.s32.totalorder %s8003_s4, %s6542_s10  ;;  %p6546_p0 = scmp.lt.u32.totalorder %s6542_s10, %s8003_s4 }
 0x617   :  { %p6548_p1 = pnand %p6546_p0, %p6543_p13 }
 0x619   :  { %6551 = shalt.err (!%p6548_p1)
}
 0x61a   :  { %s6577_s23 = smov 128  }
 0x61b   :  { %5893 = dma.vmem_to_hbm [thread:$0]  %s5888_s8, 256, %s8003_s4, [#allocation3], %s6577_s23, %s6577_s23, %s6567_s2  }
 0x61c   :  { %6552 = dma.done.wait [#allocation3], 256  }
 0x61d   :  { %6553 = vsyncadd [#allocation3], 4294967040 }
 0x61e   :  { %6554 = dma.done.wait [#allocation5], 128  }
 0x61f   :  { %6555 = vsyncadd [#allocation5], 4294967168 }
 0x620   :  { %5910 = vsyncpa [#allocation3], 1 }
 0x621   :  { %5911 = vsyncpa [#allocation5], 1 }

</bundles_post_ra>
